<compile_context>
chip_gen: v7x
topology: tpu7x:2x2x1
jax: 0.10.0
libtpu: 0.0.40
codegen_flags: <defaults>
</compile_context>

<pallas_src>
import functools

import numpy as np
import jax
import jax.numpy as jnp
from jax.experimental import pallas as pl
from jax.experimental.pallas import tpu as pltpu

_EPS = 1e-5


def msff_kernel(x_ref, mask_ref,
                w1_ref, s1_ref, b1_ref,
                se_w1_ref, se_w2_ref,
                w2a_ref, s2a_ref, b2a_ref,
                w2b_ref, s2b_ref, b2b_ref,
                out_ref,
                patches_ref, m_ref,
                *, H, W, bblk, cpad):
    HW = H * W
    N = bblk * HW                           # lanes in this grid step
    x = x_ref[...]                          # (C, N) f32, lane-dense
    valid = mask_ref[...] > 0.5             # (9*C, N) bool, hoisted once

    def conv3x3_bn_relu(act, w_bf16, scale, bias):
        # 3x3 'same' conv as ONE im2col matmul: (cout, 9*C) @ (9*C, N).
        # Spatial shifts are lane rolls over the whole multi-image slab; any
        # pixel whose true source lies outside its own image (incl. cross-image
        # wrap at chunk boundaries) is zeroed by the precomputed border mask.
        for k in range(9):
            dy, dx = divmod(k, 3)
            s = (dy - 1) * W + (dx - 1)                      # flat lane shift
            r0 = k * cpad                                    # 8-aligned rows
            if s == 0:
                patches_ref[r0:r0 + cpad, :] = act           # centre tap
            else:
                patches_ref[r0:r0 + cpad, :] = pltpu.roll(
                    act, shift=(-s) % N, axis=1)
        patches = jnp.where(valid, patches_ref[...], 0.0).astype(jnp.bfloat16)
        y = jnp.dot(w_bf16, patches, preferred_element_type=jnp.float32)
        return jnp.maximum(y * scale + bias, 0.0)            # folded BN + ReLU

    # ---- conv1 + folded BN + ReLU ----
    y1 = conv3x3_bn_relu(x, w1_ref[...], s1_ref[...], b1_ref[...])   # (C, N)

    # ---- SE attention + branch product, per image (VPU/XLU only) ----
    se_w1 = se_w1_ref[...]                   # (C, Cr)
    se_w2 = se_w2_ref[...]                   # (C, Cr) == W2^T
    for b in range(bblk):                    # bblk is small & static
        lo, hi = b * HW, (b + 1) * HW        # 128-aligned lane slice
        xs = x[:, lo:hi]
        pooled = jnp.mean(xs, axis=1, keepdims=True)                       # (C,1)
        hid = jnp.maximum(
            jnp.sum(se_w1 * pooled, axis=0, keepdims=True), 0.0)           # (1,Cr)
        att = jax.nn.sigmoid(
            jnp.sum(se_w2 * hid, axis=1, keepdims=True))                   # (C,1)
        m_ref[:, lo:hi] = y1[:, lo:hi] * (xs * att)

    m = m_ref[...]                                                          # (C, N)

    # ---- conv2: C -> C/2 -> C/2 (half-channel dim zero-padded to C) ----
    y2 = conv3x3_bn_relu(m, w2a_ref[...], s2a_ref[...], b2a_ref[...])       # (C, N)
    y3 = conv3x3_bn_relu(y2, w2b_ref[...], s2b_ref[...], b2b_ref[...])      # (C, N)

    out_ref[...] = y3


# ----------------------------- glue (plain JAX) -----------------------------

def _flatten_w(w_oihw, cout_pad, cin_pad):
    # (cout, cin, 3, 3) -> zero-pad -> (cout_pad, 9*cin_pad), bf16 for the MXU.
    # Column index = (3*dy+dx)*cin_pad + c, matching patches row k*cin_pad + c.
    cout, cin = w_oihw.shape[:2]
    w = jnp.zeros((cout_pad, cin_pad, 3, 3), jnp.float32)
    w = w.at[:cout, :cin].set(w_oihw.astype(jnp.float32))
    return jnp.transpose(w, (0, 2, 3, 1)).reshape(
        cout_pad, 9 * cin_pad).astype(jnp.bfloat16)


def _fold_bn(conv_b, gamma, beta, mean, var, cout_pad):
    scale = gamma / jnp.sqrt(var + _EPS)
    bias = beta + (conv_b - mean) * scale
    cout = scale.shape[0]
    sp = jnp.zeros((cout_pad,), jnp.float32).at[:cout].set(scale)
    bp = jnp.zeros((cout_pad,), jnp.float32).at[:cout].set(bias)
    return sp[:, None], bp[:, None]            # (cout_pad, 1) f32 columns


def _border_mask(H, W):
    # mask[3*dy+dx, h*W+w] = 1 if the (dy-1, dx-1)-shifted source pixel lies
    # inside the image ('same' zero padding), else 0.
    hh, ww = np.meshgrid(np.arange(H), np.arange(W), indexing="ij")
    rows = []
    for dy in range(3):
        for dx in range(3):
            v = ((hh + dy - 1 >= 0) & (hh + dy - 1 < H) &
                 (ww + dx - 1 >= 0) & (ww + dx - 1 < W))
            rows.append(v.reshape(-1))
    return np.stack(rows).astype(np.float32)   # (9, H*W)


def msff_block(x_nchw, p, *, batch_block=None):
    """batch_block=None collapses the whole batch into one grid step
    (best on single-TC v5e/v6e); pass batch_block=B//2 on dual-TC v7x."""
    B, C, H, W = x_nchw.shape
    assert C % 8 == 0 and C % 4 == 0, "demo requires C multiple of 8 (and 4 for SE)"
    Ch, Cr, HW = C // 2, C // 4, H * W
    Bblk = B if batch_block is None else batch_block
    assert B % Bblk == 0
    nsteps = B // Bblk
    N = Bblk * HW

    # spatial-on-lane, images concatenated along lanes: (C, B*HW)
    x = jnp.transpose(
        x_nchw.astype(jnp.float32).reshape(B, C, HW), (1, 0, 2)).reshape(C, B * HW)

    # conv weights (half-channel dims zero-padded up to C), folded BN, SE weights
    w1 = _flatten_w(p["conv1_w"], C, C)
    s1, b1 = _fold_bn(p["conv1_b"], *p["bn1"], cout_pad=C)
    w2a = _flatten_w(p["conv2a_w"], C, C)
    s2a, b2a = _fold_bn(p["conv2a_b"], *p["bn2a"], cout_pad=C)
    w2b = _flatten_w(p["conv2b_w"], C, C)
    s2b, b2b = _fold_bn(p["conv2b_b"], *p["bn2b"], cout_pad=C)
    se_w1 = p["se_w1"].astype(jnp.float32)                    # (C, Cr)
    se_w2 = jnp.transpose(p["se_w2"]).astype(jnp.float32)     # (Cr, C) -> (C, Cr)

    # full border mask: 9 taps x C channel rows each, tiled over Bblk images
    mask9 = _border_mask(H, W)                                # (9, HW)
    mask_full = jnp.asarray(
        np.tile(np.repeat(mask9, C, axis=0), (1, Bblk)))      # (9*C, Bblk*HW)

    def fixed(shape):
        # constant index_map -> block stays VMEM-resident across grid steps
        return pl.BlockSpec(shape, lambda b: (0,) * len(shape))

    kernel = functools.partial(msff_kernel, H=H, W=W, bblk=Bblk, cpad=C)
    out = pl.pallas_call(
        kernel,
        out_shape=jax.ShapeDtypeStruct((C, B * HW), jnp.float32),
        grid_spec=pltpu.PrefetchScalarGridSpec(
            num_scalar_prefetch=0,
            grid=(nsteps,),
            in_specs=[
                pl.BlockSpec((C, N), lambda b: (0, b)),       # activations
                fixed((9 * C, N)),                            # border mask
                fixed((C, 9 * C)), fixed((C, 1)), fixed((C, 1)),
                fixed((C, Cr)), fixed((C, Cr)),
                fixed((C, 9 * C)), fixed((C, 1)), fixed((C, 1)),
                fixed((C, 9 * C)), fixed((C, 1)), fixed((C, 1)),
            ],
            out_specs=pl.BlockSpec((C, N), lambda b: (0, b)),
            scratch_shapes=[
                pltpu.VMEM((9 * C, N), jnp.float32),          # shared patches slab
                pltpu.VMEM((C, N), jnp.float32),              # branch product
            ]),
        # grid steps are independent images -> megacore split when nsteps >= 2
        compiler_params=pltpu.CompilerParams(
            dimension_semantics=("parallel",)),
    )(x, mask_full, w1, s1, b1, se_w1, se_w2, w2a, s2a, b2a, w2b, s2b, b2b)

    out = out[:Ch].reshape(Ch, B, HW)                          # drop channel pad
    return jnp.transpose(out, (1, 0, 2)).reshape(B, Ch, H, W)  # NCHW


def msff_reference(x_nchw, p):
    """Pure-JAX f32 reference (lax.conv) for correctness checking."""
    x = jnp.transpose(x_nchw, (0, 2, 3, 1)).astype(jnp.float32)

    def conv_bn_relu(h, w_oihw, bias, bn):
        gamma, beta, mean, var = bn
        w = jnp.transpose(w_oihw, (2, 3, 1, 0))   # HWIO
        y = jax.lax.conv_general_dilated(
            h, w, (1, 1), "SAME",
            dimension_numbers=("NHWC", "HWIO", "NHWC")) + bias
        y = (y - mean) / jnp.sqrt(var + _EPS) * gamma + beta
        return jnp.maximum(y, 0.0)

    x_conv = conv_bn_relu(x, p["conv1_w"], p["conv1_b"], p["bn1"])
    pooled = jnp.mean(x, axis=(1, 2))                      # (B, C)
    hid = jnp.maximum(pooled @ p["se_w1"], 0.0)
    scale = jax.nn.sigmoid(hid @ p["se_w2"])
    x_att = x * scale[:, None, None, :]
    h = x_conv * x_att
    h = conv_bn_relu(h, p["conv2a_w"], p["conv2a_b"], p["bn2a"])
    h = conv_bn_relu(h, p["conv2b_w"], p["conv2b_b"], p["bn2b"])
    return jnp.transpose(h, (0, 3, 1, 2))


def init_params(key, C):
    Ch, Cr = C // 2, C // 4
    ks = jax.random.split(key, 11)

    def bn(k, c):
        k1, k2, k3, k4 = jax.random.split(k, 4)
        gamma = 1.0 + 0.1 * jax.random.normal(k1, (c,), jnp.float32)
        beta = 0.1 * jax.random.normal(k2, (c,), jnp.float32)
        mean = 0.1 * jax.random.normal(k3, (c,), jnp.float32)
        var = jax.random.uniform(k4, (c,), jnp.float32, 0.5, 1.5)
        return (gamma, beta, mean, var)

    return {
        "conv1_w": 0.1 * jax.random.normal(ks[0], (C, C, 3, 3), jnp.float32),
        "conv1_b": 0.1 * jax.random.normal(ks[1], (C,), jnp.float32),
        "bn1": bn(ks[2], C),
        # SE(ratio=4): Linear(C, C//4, bias=False) / Linear(C//4, C, bias=False)
        # stored here in (in, out) layout.
        "se_w1": 0.3 * jax.random.normal(ks[3], (C, Cr), jnp.float32),
        "se_w2": 0.3 * jax.random.normal(ks[4], (Cr, C), jnp.float32),
        "conv2a_w": 0.1 * jax.random.normal(ks[5], (Ch, C, 3, 3), jnp.float32),
        "conv2a_b": 0.1 * jax.random.normal(ks[6], (Ch,), jnp.float32),
        "bn2a": bn(ks[7], Ch),
        "conv2b_w": 0.1 * jax.random.normal(ks[8], (Ch, Ch, 3, 3), jnp.float32),
        "conv2b_b": 0.1 * jax.random.normal(ks[9], (Ch,), jnp.float32),
        "bn2b": bn(ks[10], Ch),
    }


if __name__ == "__main__":
    B, C, H, W = 2, 8, 16, 16          # in_channel=8 (divisible by SE ratio 4)
    key = jax.random.PRNGKey(0)
    kx, kp = jax.random.split(key)
    x = jax.random.normal(kx, (B, C, H, W), jnp.float32)   # NCHW like PyTorch
    params = init_params(kp, C)

    ref = jax.block_until_ready(msff_reference(x, params))

    # Tolerance is loosened vs. an all-f32 kernel because the MXU matmuls use
    # bf16 operands (f32 accumulation); epilogue math stays f32.
    RTOL, ATOL = 3e-2, 3e-2

    # Default: whole batch in a single grid step (v5e/v6e single-TC path).
    out = jax.block_until_ready(msff_block(x, params))
    assert out.shape == (B, C // 2, H, W), out.shape
    np.testing.assert_allclose(np.asarray(out), np.asarray(ref),
                               rtol=RTOL, atol=ATOL)

    # Split path (what you'd use on dual-TC v7x): 2 parallel grid steps.
    out2 = jax.block_until_ready(msff_block(x, params, batch_block=1))
    np.testing.assert_allclose(np.asarray(out2), np.asarray(ref),
                               rtol=RTOL, atol=ATOL)

    print("KERNEL_OK")
</pallas_src>

<mosaic_0001>
module attributes {stable_mosaic.version = 11 : i64} {
  func.func @msff_kernel(%arg0: i32, %arg1: memref<8x512xf32, #tpu.memory_space<vmem>>, %arg2: memref<72x512xf32, #tpu.memory_space<vmem>>, %arg3: memref<8x72xbf16, #tpu.memory_space<vmem>>, %arg4: memref<8x1xf32, #tpu.memory_space<vmem>>, %arg5: memref<8x1xf32, #tpu.memory_space<vmem>>, %arg6: memref<8x2xf32, #tpu.memory_space<vmem>>, %arg7: memref<8x2xf32, #tpu.memory_space<vmem>>, %arg8: memref<8x72xbf16, #tpu.memory_space<vmem>>, %arg9: memref<8x1xf32, #tpu.memory_space<vmem>>, %arg10: memref<8x1xf32, #tpu.memory_space<vmem>>, %arg11: memref<8x72xbf16, #tpu.memory_space<vmem>>, %arg12: memref<8x1xf32, #tpu.memory_space<vmem>>, %arg13: memref<8x1xf32, #tpu.memory_space<vmem>>, %arg14: memref<8x512xf32, #tpu.memory_space<vmem>>, %arg15: memref<72x512xf32, #tpu.memory_space<vmem>>, %arg16: memref<8x512xf32, #tpu.memory_space<vmem>>) attributes {dimension_semantics = [#tpu.dimension_semantics<parallel>], iteration_bounds = array<i64: 1>, scalar_prefetch = 0 : i64, scratch_operands = 2 : i64, tpu.core_type = #tpu.core_type<tc>, window_params = [{transform_indices = @transform_0, window_bounds = array<i64: 8, 512>}, {pipeline_mode = #tpu.pipeline_mode<synchronous>, transform_indices = @transform_1, window_bounds = array<i64: 72, 512>}, {pipeline_mode = #tpu.pipeline_mode<synchronous>, transform_indices = @transform_2, window_bounds = array<i64: 8, 72>}, {pipeline_mode = #tpu.pipeline_mode<synchronous>, transform_indices = @transform_3, window_bounds = array<i64: 8, 1>}, {pipeline_mode = #tpu.pipeline_mode<synchronous>, transform_indices = @transform_4, window_bounds = array<i64: 8, 1>}, {pipeline_mode = #tpu.pipeline_mode<synchronous>, transform_indices = @transform_5, window_bounds = array<i64: 8, 2>}, {pipeline_mode = #tpu.pipeline_mode<synchronous>, transform_indices = @transform_6, window_bounds = array<i64: 8, 2>}, {pipeline_mode = #tpu.pipeline_mode<synchronous>, transform_indices = @transform_7, window_bounds = array<i64: 8, 72>}, {pipeline_mode = #tpu.pipeline_mode<synchronous>, transform_indices = @transform_8, window_bounds = array<i64: 8, 1>}, {pipeline_mode = #tpu.pipeline_mode<synchronous>, transform_indices = @transform_9, window_bounds = array<i64: 8, 1>}, {pipeline_mode = #tpu.pipeline_mode<synchronous>, transform_indices = @transform_10, window_bounds = array<i64: 8, 72>}, {pipeline_mode = #tpu.pipeline_mode<synchronous>, transform_indices = @transform_11, window_bounds = array<i64: 8, 1>}, {pipeline_mode = #tpu.pipeline_mode<synchronous>, transform_indices = @transform_12, window_bounds = array<i64: 8, 1>}, {transform_indices = @transform_13, window_bounds = array<i64: 8, 512>}]} {
    %c0 = arith.constant 0 : index
    %c0_0 = arith.constant 0 : index
    %0 = vector.load %arg1[%c0, %c0_0] : memref<8x512xf32, #tpu.memory_space<vmem>>, vector<8x512xf32>
    %c0_1 = arith.constant 0 : index
    %c0_2 = arith.constant 0 : index
    %1 = vector.load %arg2[%c0_1, %c0_2] : memref<72x512xf32, #tpu.memory_space<vmem>>, vector<72x512xf32>
    %cst = arith.constant 5.000000e-01 : f32
    %2 = vector.broadcast %cst : f32 to vector<72x512xf32>
    %3 = arith.cmpf ogt, %1, %2 : vector<72x512xf32>
    %c0_3 = arith.constant 0 : index
    %c0_4 = arith.constant 0 : index
    %4 = vector.load %arg3[%c0_3, %c0_4] : memref<8x72xbf16, #tpu.memory_space<vmem>>, vector<8x72xbf16>
    %c0_5 = arith.constant 0 : index
    %c0_6 = arith.constant 0 : index
    %5 = vector.load %arg4[%c0_5, %c0_6] : memref<8x1xf32, #tpu.memory_space<vmem>>, vector<8x1xf32>
    %c0_7 = arith.constant 0 : index
    %c0_8 = arith.constant 0 : index
    %6 = vector.load %arg5[%c0_7, %c0_8] : memref<8x1xf32, #tpu.memory_space<vmem>>, vector<8x1xf32>
    %c17_i32 = arith.constant 17 : i32
    %7 = tpu.dynamic_rotate %0 by %c17_i32 dim 1 : vector<8x512xf32>, i32 -> vector<8x512xf32>
    %c0_9 = arith.constant 0 : index
    %c0_10 = arith.constant 0 : index
    %8 = vector.load %arg15[%c0_9, %c0_10] : memref<72x512xf32, #tpu.memory_space<vmem>>, vector<8x512xf32>
    tpu.vector_store %arg15[%c0_9, %c0_10], %7 {strides = array<i32>} : memref<72x512xf32, #tpu.memory_space<vmem>>, vector<8x512xf32>,
    %c16_i32 = arith.constant 16 : i32
    %9 = tpu.dynamic_rotate %0 by %c16_i32 dim 1 : vector<8x512xf32>, i32 -> vector<8x512xf32>
    %c8 = arith.constant 8 : index
    %c0_11 = arith.constant 0 : index
    %10 = vector.load %arg15[%c8, %c0_11] : memref<72x512xf32, #tpu.memory_space<vmem>>, vector<8x512xf32>
    tpu.vector_store %arg15[%c8, %c0_11], %9 {strides = array<i32>} : memref<72x512xf32, #tpu.memory_space<vmem>>, vector<8x512xf32>,
    %c15_i32 = arith.constant 15 : i32
    %11 = tpu.dynamic_rotate %0 by %c15_i32 dim 1 : vector<8x512xf32>, i32 -> vector<8x512xf32>
    %c16 = arith.constant 16 : index
    %c0_12 = arith.constant 0 : index
    %12 = vector.load %arg15[%c16, %c0_12] : memref<72x512xf32, #tpu.memory_space<vmem>>, vector<8x512xf32>
    tpu.vector_store %arg15[%c16, %c0_12], %11 {strides = array<i32>} : memref<72x512xf32, #tpu.memory_space<vmem>>, vector<8x512xf32>,
    %c1_i32 = arith.constant 1 : i32
    %13 = tpu.dynamic_rotate %0 by %c1_i32 dim 1 : vector<8x512xf32>, i32 -> vector<8x512xf32>
    %c24 = arith.constant 24 : index
    %c0_13 = arith.constant 0 : index
    %14 = vector.load %arg15[%c24, %c0_13] : memref<72x512xf32, #tpu.memory_space<vmem>>, vector<8x512xf32>
    tpu.vector_store %arg15[%c24, %c0_13], %13 {strides = array<i32>} : memref<72x512xf32, #tpu.memory_space<vmem>>, vector<8x512xf32>,
    %c32 = arith.constant 32 : index
    %c0_14 = arith.constant 0 : index
    %15 = vector.load %arg15[%c32, %c0_14] : memref<72x512xf32, #tpu.memory_space<vmem>>, vector<8x512xf32>
    tpu.vector_store %arg15[%c32, %c0_14], %0 {strides = array<i32>} : memref<72x512xf32, #tpu.memory_space<vmem>>, vector<8x512xf32>,
    %c511_i32 = arith.constant 511 : i32
    %16 = tpu.dynamic_rotate %0 by %c511_i32 dim 1 : vector<8x512xf32>, i32 -> vector<8x512xf32>
    %c40 = arith.constant 40 : index
    %c0_15 = arith.constant 0 : index
    %17 = vector.load %arg15[%c40, %c0_15] : memref<72x512xf32, #tpu.memory_space<vmem>>, vector<8x512xf32>
    tpu.vector_store %arg15[%c40, %c0_15], %16 {strides = array<i32>} : memref<72x512xf32, #tpu.memory_space<vmem>>, vector<8x512xf32>,
    %c497_i32 = arith.constant 497 : i32
    %18 = tpu.dynamic_rotate %0 by %c497_i32 dim 1 : vector<8x512xf32>, i32 -> vector<8x512xf32>
    %c48 = arith.constant 48 : index
    %c0_16 = arith.constant 0 : index
    %19 = vector.load %arg15[%c48, %c0_16] : memref<72x512xf32, #tpu.memory_space<vmem>>, vector<8x512xf32>
    tpu.vector_store %arg15[%c48, %c0_16], %18 {strides = array<i32>} : memref<72x512xf32, #tpu.memory_space<vmem>>, vector<8x512xf32>,
    %c496_i32 = arith.constant 496 : i32
    %20 = tpu.dynamic_rotate %0 by %c496_i32 dim 1 : vector<8x512xf32>, i32 -> vector<8x512xf32>
    %c56 = arith.constant 56 : index
    %c0_17 = arith.constant 0 : index
    %21 = vector.load %arg15[%c56, %c0_17] : memref<72x512xf32, #tpu.memory_space<vmem>>, vector<8x512xf32>
    tpu.vector_store %arg15[%c56, %c0_17], %20 {strides = array<i32>} : memref<72x512xf32, #tpu.memory_space<vmem>>, vector<8x512xf32>,
    %c495_i32 = arith.constant 495 : i32
    %22 = tpu.dynamic_rotate %0 by %c495_i32 dim 1 : vector<8x512xf32>, i32 -> vector<8x512xf32>
    %c64 = arith.constant 64 : index
    %c0_18 = arith.constant 0 : index
    %23 = vector.load %arg15[%c64, %c0_18] : memref<72x512xf32, #tpu.memory_space<vmem>>, vector<8x512xf32>
    tpu.vector_store %arg15[%c64, %c0_18], %22 {strides = array<i32>} : memref<72x512xf32, #tpu.memory_space<vmem>>, vector<8x512xf32>,
    %c0_19 = arith.constant 0 : index
    %c0_20 = arith.constant 0 : index
    %24 = vector.load %arg15[%c0_19, %c0_20] : memref<72x512xf32, #tpu.memory_space<vmem>>, vector<72x512xf32>
    %cst_21 = arith.constant 0.000000e+00 : f32
    %25 = vector.broadcast %cst_21 : f32 to vector<72x512xf32>
    %26 = arith.select %3, %24, %25 : vector<72x512xi1>, vector<72x512xf32>
    %27 = arith.truncf %26 : vector<72x512xf32> to vector<72x512xbf16>
    %cst_22 = arith.constant dense<0.000000e+00> : vector<8x512xf32>
    %28 = tpu.matmul %4, %27, %cst_22 {dimension_numbers = #tpu.dot_dimension_numbers<[1], [0], [0], [1], [0, 0, 1, 1], [], []>} : vector<8x72xbf16>, vector<72x512xbf16>, vector<8x512xf32> -> vector<8x512xf32>
    %29 = vector.broadcast %5 : vector<8x1xf32> to vector<8x512xf32>
    %30 = arith.mulf %28, %29 : vector<8x512xf32>
    %31 = vector.broadcast %6 : vector<8x1xf32> to vector<8x512xf32>
    %32 = arith.addf %30, %31 : vector<8x512xf32>
    %cst_23 = arith.constant 0.000000e+00 : f32
    %33 = vector.broadcast %cst_23 : f32 to vector<8x512xf32>
    %34 = arith.maximumf %32, %33 : vector<8x512xf32>
    %c0_24 = arith.constant 0 : index
    %c0_25 = arith.constant 0 : index
    %35 = vector.load %arg6[%c0_24, %c0_25] : memref<8x2xf32, #tpu.memory_space<vmem>>, vector<8x2xf32>
    %c0_26 = arith.constant 0 : index
    %c0_27 = arith.constant 0 : index
    %36 = vector.load %arg7[%c0_26, %c0_27] : memref<8x2xf32, #tpu.memory_space<vmem>>, vector<8x2xf32>
    %37 = vector.extract_strided_slice %0 {offsets = [0, 0], sizes = [8, 256], strides = [1, 1]} : vector<8x512xf32> to vector<8x256xf32>
    %cst_28 = arith.constant dense<0.000000e+00> : vector<8xf32>
    %38 = vector.multi_reduction <add>, %37, %cst_28 [1] : vector<8x256xf32> to vector<8xf32>
    %39 = vector.shape_cast %38 : vector<8xf32> to vector<8x1xf32>
    %cst_29 = arith.constant 2.560000e+02 : f32
    %40 = vector.broadcast %cst_29 : f32 to vector<8x1xf32>
    %41 = arith.divf %39, %40 : vector<8x1xf32>
    %42 = vector.broadcast %41 : vector<8x1xf32> to vector<8x2xf32>
    %43 = arith.mulf %35, %42 : vector<8x2xf32>
    %cst_30 = arith.constant dense<0.000000e+00> : vector<2xf32>
    %44 = vector.multi_reduction <add>, %43, %cst_30 [0] : vector<8x2xf32> to vector<2xf32>
    %45 = vector.shape_cast %44 : vector<2xf32> to vector<1x2xf32>
    %cst_31 = arith.constant 0.000000e+00 : f32
    %46 = vector.broadcast %cst_31 : f32 to vector<1x2xf32>
    %47 = arith.maximumf %45, %46 : vector<1x2xf32>
    %48 = vector.broadcast %47 : vector<1x2xf32> to vector<8x2xf32>
    %49 = arith.mulf %36, %48 : vector<8x2xf32>
    %cst_32 = arith.constant dense<0.000000e+00> : vector<8xf32>
    %50 = vector.multi_reduction <add>, %49, %cst_32 [1] : vector<8x2xf32> to vector<8xf32>
    %51 = vector.shape_cast %50 : vector<8xf32> to vector<8x1xf32>
    %52 = arith.negf %51 : vector<8x1xf32>
    %53 = math.exp %52 : vector<8x1xf32>
    %cst_33 = arith.constant 1.000000e+00 : f32
    %54 = vector.broadcast %cst_33 : f32 to vector<8x1xf32>
    %55 = arith.addf %54, %53 : vector<8x1xf32>
    %56 = arith.divf %54, %55 : vector<8x1xf32>
    %57 = vector.extract_strided_slice %34 {offsets = [0, 0], sizes = [8, 256], strides = [1, 1]} : vector<8x512xf32> to vector<8x256xf32>
    %58 = vector.broadcast %56 : vector<8x1xf32> to vector<8x256xf32>
    %59 = arith.mulf %37, %58 : vector<8x256xf32>
    %60 = arith.mulf %57, %59 : vector<8x256xf32>
    %c0_34 = arith.constant 0 : index
    %c0_35 = arith.constant 0 : index
    %61 = vector.load %arg16[%c0_34, %c0_35] : memref<8x512xf32, #tpu.memory_space<vmem>>, vector<8x256xf32>
    tpu.vector_store %arg16[%c0_34, %c0_35], %60 {strides = array<i32>} : memref<8x512xf32, #tpu.memory_space<vmem>>, vector<8x256xf32>,
    %62 = vector.extract_strided_slice %0 {offsets = [0, 256], sizes = [8, 256], strides = [1, 1]} : vector<8x512xf32> to vector<8x256xf32>
    %cst_36 = arith.constant dense<0.000000e+00> : vector<8xf32>
    %63 = vector.multi_reduction <add>, %62, %cst_36 [1] : vector<8x256xf32> to vector<8xf32>
    %64 = vector.shape_cast %63 : vector<8xf32> to vector<8x1xf32>
    %cst_37 = arith.constant 2.560000e+02 : f32
    %65 = vector.broadcast %cst_37 : f32 to vector<8x1xf32>
    %66 = arith.divf %64, %65 : vector<8x1xf32>
    %67 = vector.broadcast %66 : vector<8x1xf32> to vector<8x2xf32>
    %68 = arith.mulf %35, %67 : vector<8x2xf32>
    %cst_38 = arith.constant dense<0.000000e+00> : vector<2xf32>
    %69 = vector.multi_reduction <add>, %68, %cst_38 [0] : vector<8x2xf32> to vector<2xf32>
    %70 = vector.shape_cast %69 : vector<2xf32> to vector<1x2xf32>
    %cst_39 = arith.constant 0.000000e+00 : f32
    %71 = vector.broadcast %cst_39 : f32 to vector<1x2xf32>
    %72 = arith.maximumf %70, %71 : vector<1x2xf32>
    %73 = vector.broadcast %72 : vector<1x2xf32> to vector<8x2xf32>
    %74 = arith.mulf %36, %73 : vector<8x2xf32>
    %cst_40 = arith.constant dense<0.000000e+00> : vector<8xf32>
    %75 = vector.multi_reduction <add>, %74, %cst_40 [1] : vector<8x2xf32> to vector<8xf32>
    %76 = vector.shape_cast %75 : vector<8xf32> to vector<8x1xf32>
    %77 = arith.negf %76 : vector<8x1xf32>
    %78 = math.exp %77 : vector<8x1xf32>
    %cst_41 = arith.constant 1.000000e+00 : f32
    %79 = vector.broadcast %cst_41 : f32 to vector<8x1xf32>
    %80 = arith.addf %79, %78 : vector<8x1xf32>
    %81 = arith.divf %79, %80 : vector<8x1xf32>
    %82 = vector.extract_strided_slice %34 {offsets = [0, 256], sizes = [8, 256], strides = [1, 1]} : vector<8x512xf32> to vector<8x256xf32>
    %83 = vector.broadcast %81 : vector<8x1xf32> to vector<8x256xf32>
    %84 = arith.mulf %62, %83 : vector<8x256xf32>
    %85 = arith.mulf %82, %84 : vector<8x256xf32>
    %c0_42 = arith.constant 0 : index
    %c256 = arith.constant 256 : index
    %86 = vector.load %arg16[%c0_42, %c256] : memref<8x512xf32, #tpu.memory_space<vmem>>, vector<8x256xf32>
    tpu.vector_store %arg16[%c0_42, %c256], %85 {strides = array<i32>} : memref<8x512xf32, #tpu.memory_space<vmem>>, vector<8x256xf32>,
    %c0_43 = arith.constant 0 : index
    %c0_44 = arith.constant 0 : index
    %87 = vector.load %arg16[%c0_43, %c0_44] : memref<8x512xf32, #tpu.memory_space<vmem>>, vector<8x512xf32>
    %c0_45 = arith.constant 0 : index
    %c0_46 = arith.constant 0 : index
    %88 = vector.load %arg8[%c0_45, %c0_46] : memref<8x72xbf16, #tpu.memory_space<vmem>>, vector<8x72xbf16>
    %c0_47 = arith.constant 0 : index
    %c0_48 = arith.constant 0 : index
    %89 = vector.load %arg9[%c0_47, %c0_48] : memref<8x1xf32, #tpu.memory_space<vmem>>, vector<8x1xf32>
    %c0_49 = arith.constant 0 : index
    %c0_50 = arith.constant 0 : index
    %90 = vector.load %arg10[%c0_49, %c0_50] : memref<8x1xf32, #tpu.memory_space<vmem>>, vector<8x1xf32>
    %c17_i32_51 = arith.constant 17 : i32
    %91 = tpu.dynamic_rotate %87 by %c17_i32_51 dim 1 : vector<8x512xf32>, i32 -> vector<8x512xf32>
    %c0_52 = arith.constant 0 : index
    %c0_53 = arith.constant 0 : index
    %92 = vector.load %arg15[%c0_52, %c0_53] : memref<72x512xf32, #tpu.memory_space<vmem>>, vector<8x512xf32>
    tpu.vector_store %arg15[%c0_52, %c0_53], %91 {strides = array<i32>} : memref<72x512xf32, #tpu.memory_space<vmem>>, vector<8x512xf32>,
    %c16_i32_54 = arith.constant 16 : i32
    %93 = tpu.dynamic_rotate %87 by %c16_i32_54 dim 1 : vector<8x512xf32>, i32 -> vector<8x512xf32>
    %c8_55 = arith.constant 8 : index
    %c0_56 = arith.constant 0 : index
    %94 = vector.load %arg15[%c8_55, %c0_56] : memref<72x512xf32, #tpu.memory_space<vmem>>, vector<8x512xf32>
    tpu.vector_store %arg15[%c8_55, %c0_56], %93 {strides = array<i32>} : memref<72x512xf32, #tpu.memory_space<vmem>>, vector<8x512xf32>,
    %c15_i32_57 = arith.constant 15 : i32
    %95 = tpu.dynamic_rotate %87 by %c15_i32_57 dim 1 : vector<8x512xf32>, i32 -> vector<8x512xf32>
    %c16_58 = arith.constant 16 : index
    %c0_59 = arith.constant 0 : index
    %96 = vector.load %arg15[%c16_58, %c0_59] : memref<72x512xf32, #tpu.memory_space<vmem>>, vector<8x512xf32>
    tpu.vector_store %arg15[%c16_58, %c0_59], %95 {strides = array<i32>} : memref<72x512xf32, #tpu.memory_space<vmem>>, vector<8x512xf32>,
    %c1_i32_60 = arith.constant 1 : i32
    %97 = tpu.dynamic_rotate %87 by %c1_i32_60 dim 1 : vector<8x512xf32>, i32 -> vector<8x512xf32>
    %c24_61 = arith.constant 24 : index
    %c0_62 = arith.constant 0 : index
    %98 = vector.load %arg15[%c24_61, %c0_62] : memref<72x512xf32, #tpu.memory_space<vmem>>, vector<8x512xf32>
    tpu.vector_store %arg15[%c24_61, %c0_62], %97 {strides = array<i32>} : memref<72x512xf32, #tpu.memory_space<vmem>>, vector<8x512xf32>,
    %c32_63 = arith.constant 32 : index
    %c0_64 = arith.constant 0 : index
    %99 = vector.load %arg15[%c32_63, %c0_64] : memref<72x512xf32, #tpu.memory_space<vmem>>, vector<8x512xf32>
    tpu.vector_store %arg15[%c32_63, %c0_64], %87 {strides = array<i32>} : memref<72x512xf32, #tpu.memory_space<vmem>>, vector<8x512xf32>,
    %c511_i32_65 = arith.constant 511 : i32
    %100 = tpu.dynamic_rotate %87 by %c511_i32_65 dim 1 : vector<8x512xf32>, i32 -> vector<8x512xf32>
    %c40_66 = arith.constant 40 : index
    %c0_67 = arith.constant 0 : index
    %101 = vector.load %arg15[%c40_66, %c0_67] : memref<72x512xf32, #tpu.memory_space<vmem>>, vector<8x512xf32>
    tpu.vector_store %arg15[%c40_66, %c0_67], %100 {strides = array<i32>} : memref<72x512xf32, #tpu.memory_space<vmem>>, vector<8x512xf32>,
    %c497_i32_68 = arith.constant 497 : i32
    %102 = tpu.dynamic_rotate %87 by %c497_i32_68 dim 1 : vector<8x512xf32>, i32 -> vector<8x512xf32>
    %c48_69 = arith.constant 48 : index
    %c0_70 = arith.constant 0 : index
    %103 = vector.load %arg15[%c48_69, %c0_70] : memref<72x512xf32, #tpu.memory_space<vmem>>, vector<8x512xf32>
    tpu.vector_store %arg15[%c48_69, %c0_70], %102 {strides = array<i32>} : memref<72x512xf32, #tpu.memory_space<vmem>>, vector<8x512xf32>,
    %c496_i32_71 = arith.constant 496 : i32
    %104 = tpu.dynamic_rotate %87 by %c496_i32_71 dim 1 : vector<8x512xf32>, i32 -> vector<8x512xf32>
    %c56_72 = arith.constant 56 : index
    %c0_73 = arith.constant 0 : index
    %105 = vector.load %arg15[%c56_72, %c0_73] : memref<72x512xf32, #tpu.memory_space<vmem>>, vector<8x512xf32>
    tpu.vector_store %arg15[%c56_72, %c0_73], %104 {strides = array<i32>} : memref<72x512xf32, #tpu.memory_space<vmem>>, vector<8x512xf32>,
    %c495_i32_74 = arith.constant 495 : i32
    %106 = tpu.dynamic_rotate %87 by %c495_i32_74 dim 1 : vector<8x512xf32>, i32 -> vector<8x512xf32>
    %c64_75 = arith.constant 64 : index
    %c0_76 = arith.constant 0 : index
    %107 = vector.load %arg15[%c64_75, %c0_76] : memref<72x512xf32, #tpu.memory_space<vmem>>, vector<8x512xf32>
    tpu.vector_store %arg15[%c64_75, %c0_76], %106 {strides = array<i32>} : memref<72x512xf32, #tpu.memory_space<vmem>>, vector<8x512xf32>,
    %c0_77 = arith.constant 0 : index
    %c0_78 = arith.constant 0 : index
    %108 = vector.load %arg15[%c0_77, %c0_78] : memref<72x512xf32, #tpu.memory_space<vmem>>, vector<72x512xf32>
    %cst_79 = arith.constant 0.000000e+00 : f32
    %109 = vector.broadcast %cst_79 : f32 to vector<72x512xf32>
    %110 = arith.select %3, %108, %109 : vector<72x512xi1>, vector<72x512xf32>
    %111 = arith.truncf %110 : vector<72x512xf32> to vector<72x512xbf16>
    %cst_80 = arith.constant dense<0.000000e+00> : vector<8x512xf32>
    %112 = tpu.matmul %88, %111, %cst_80 {dimension_numbers = #tpu.dot_dimension_numbers<[1], [0], [0], [1], [0, 0, 1, 1], [], []>} : vector<8x72xbf16>, vector<72x512xbf16>, vector<8x512xf32> -> vector<8x512xf32>
    %113 = vector.broadcast %89 : vector<8x1xf32> to vector<8x512xf32>
    %114 = arith.mulf %112, %113 : vector<8x512xf32>
    %115 = vector.broadcast %90 : vector<8x1xf32> to vector<8x512xf32>
    %116 = arith.addf %114, %115 : vector<8x512xf32>
    %cst_81 = arith.constant 0.000000e+00 : f32
    %117 = vector.broadcast %cst_81 : f32 to vector<8x512xf32>
    %118 = arith.maximumf %116, %117 : vector<8x512xf32>
    %c0_82 = arith.constant 0 : index
    %c0_83 = arith.constant 0 : index
    %119 = vector.load %arg11[%c0_82, %c0_83] : memref<8x72xbf16, #tpu.memory_space<vmem>>, vector<8x72xbf16>
    %c0_84 = arith.constant 0 : index
    %c0_85 = arith.constant 0 : index
    %120 = vector.load %arg12[%c0_84, %c0_85] : memref<8x1xf32, #tpu.memory_space<vmem>>, vector<8x1xf32>
    %c0_86 = arith.constant 0 : index
    %c0_87 = arith.constant 0 : index
    %121 = vector.load %arg13[%c0_86, %c0_87] : memref<8x1xf32, #tpu.memory_space<vmem>>, vector<8x1xf32>
    %c17_i32_88 = arith.constant 17 : i32
    %122 = tpu.dynamic_rotate %118 by %c17_i32_88 dim 1 : vector<8x512xf32>, i32 -> vector<8x512xf32>
    %c0_89 = arith.constant 0 : index
    %c0_90 = arith.constant 0 : index
    %123 = vector.load %arg15[%c0_89, %c0_90] : memref<72x512xf32, #tpu.memory_space<vmem>>, vector<8x512xf32>
    tpu.vector_store %arg15[%c0_89, %c0_90], %122 {strides = array<i32>} : memref<72x512xf32, #tpu.memory_space<vmem>>, vector<8x512xf32>,
    %c16_i32_91 = arith.constant 16 : i32
    %124 = tpu.dynamic_rotate %118 by %c16_i32_91 dim 1 : vector<8x512xf32>, i32 -> vector<8x512xf32>
    %c8_92 = arith.constant 8 : index
    %c0_93 = arith.constant 0 : index
    %125 = vector.load %arg15[%c8_92, %c0_93] : memref<72x512xf32, #tpu.memory_space<vmem>>, vector<8x512xf32>
    tpu.vector_store %arg15[%c8_92, %c0_93], %124 {strides = array<i32>} : memref<72x512xf32, #tpu.memory_space<vmem>>, vector<8x512xf32>,
    %c15_i32_94 = arith.constant 15 : i32
    %126 = tpu.dynamic_rotate %118 by %c15_i32_94 dim 1 : vector<8x512xf32>, i32 -> vector<8x512xf32>
    %c16_95 = arith.constant 16 : index
    %c0_96 = arith.constant 0 : index
    %127 = vector.load %arg15[%c16_95, %c0_96] : memref<72x512xf32, #tpu.memory_space<vmem>>, vector<8x512xf32>
    tpu.vector_store %arg15[%c16_95, %c0_96], %126 {strides = array<i32>} : memref<72x512xf32, #tpu.memory_space<vmem>>, vector<8x512xf32>,
    %c1_i32_97 = arith.constant 1 : i32
    %128 = tpu.dynamic_rotate %118 by %c1_i32_97 dim 1 : vector<8x512xf32>, i32 -> vector<8x512xf32>
    %c24_98 = arith.constant 24 : index
    %c0_99 = arith.constant 0 : index
    %129 = vector.load %arg15[%c24_98, %c0_99] : memref<72x512xf32, #tpu.memory_space<vmem>>, vector<8x512xf32>
    tpu.vector_store %arg15[%c24_98, %c0_99], %128 {strides = array<i32>} : memref<72x512xf32, #tpu.memory_space<vmem>>, vector<8x512xf32>,
    %c32_100 = arith.constant 32 : index
    %c0_101 = arith.constant 0 : index
    %130 = vector.load %arg15[%c32_100, %c0_101] : memref<72x512xf32, #tpu.memory_space<vmem>>, vector<8x512xf32>
    tpu.vector_store %arg15[%c32_100, %c0_101], %118 {strides = array<i32>} : memref<72x512xf32, #tpu.memory_space<vmem>>, vector<8x512xf32>,
    %c511_i32_102 = arith.constant 511 : i32
    %131 = tpu.dynamic_rotate %118 by %c511_i32_102 dim 1 : vector<8x512xf32>, i32 -> vector<8x512xf32>
    %c40_103 = arith.constant 40 : index
    %c0_104 = arith.constant 0 : index
    %132 = vector.load %arg15[%c40_103, %c0_104] : memref<72x512xf32, #tpu.memory_space<vmem>>, vector<8x512xf32>
    tpu.vector_store %arg15[%c40_103, %c0_104], %131 {strides = array<i32>} : memref<72x512xf32, #tpu.memory_space<vmem>>, vector<8x512xf32>,
    %c497_i32_105 = arith.constant 497 : i32
    %133 = tpu.dynamic_rotate %118 by %c497_i32_105 dim 1 : vector<8x512xf32>, i32 -> vector<8x512xf32>
    %c48_106 = arith.constant 48 : index
    %c0_107 = arith.constant 0 : index
    %134 = vector.load %arg15[%c48_106, %c0_107] : memref<72x512xf32, #tpu.memory_space<vmem>>, vector<8x512xf32>
    tpu.vector_store %arg15[%c48_106, %c0_107], %133 {strides = array<i32>} : memref<72x512xf32, #tpu.memory_space<vmem>>, vector<8x512xf32>,
    %c496_i32_108 = arith.constant 496 : i32
    %135 = tpu.dynamic_rotate %118 by %c496_i32_108 dim 1 : vector<8x512xf32>, i32 -> vector<8x512xf32>
    %c56_109 = arith.constant 56 : index
    %c0_110 = arith.constant 0 : index
    %136 = vector.load %arg15[%c56_109, %c0_110] : memref<72x512xf32, #tpu.memory_space<vmem>>, vector<8x512xf32>
    tpu.vector_store %arg15[%c56_109, %c0_110], %135 {strides = array<i32>} : memref<72x512xf32, #tpu.memory_space<vmem>>, vector<8x512xf32>,
    %c495_i32_111 = arith.constant 495 : i32
    %137 = tpu.dynamic_rotate %118 by %c495_i32_111 dim 1 : vector<8x512xf32>, i32 -> vector<8x512xf32>
    %c64_112 = arith.constant 64 : index
    %c0_113 = arith.constant 0 : index
    %138 = vector.load %arg15[%c64_112, %c0_113] : memref<72x512xf32, #tpu.memory_space<vmem>>, vector<8x512xf32>
    tpu.vector_store %arg15[%c64_112, %c0_113], %137 {strides = array<i32>} : memref<72x512xf32, #tpu.memory_space<vmem>>, vector<8x512xf32>,
    %c0_114 = arith.constant 0 : index
    %c0_115 = arith.constant 0 : index
    %139 = vector.load %arg15[%c0_114, %c0_115] : memref<72x512xf32, #tpu.memory_space<vmem>>, vector<72x512xf32>
    %cst_116 = arith.constant 0.000000e+00 : f32
    %140 = vector.broadcast %cst_116 : f32 to vector<72x512xf32>
    %141 = arith.select %3, %139, %140 : vector<72x512xi1>, vector<72x512xf32>
    %142 = arith.truncf %141 : vector<72x512xf32> to vector<72x512xbf16>
    %cst_117 = arith.constant dense<0.000000e+00> : vector<8x512xf32>
    %143 = tpu.matmul %119, %142, %cst_117 {dimension_numbers = #tpu.dot_dimension_numbers<[1], [0], [0], [1], [0, 0, 1, 1], [], []>} : vector<8x72xbf16>, vector<72x512xbf16>, vector<8x512xf32> -> vector<8x512xf32>
    %144 = vector.broadcast %120 : vector<8x1xf32> to vector<8x512xf32>
    %145 = arith.mulf %143, %144 : vector<8x512xf32>
    %146 = vector.broadcast %121 : vector<8x1xf32> to vector<8x512xf32>
    %147 = arith.addf %145, %146 : vector<8x512xf32>
    %cst_118 = arith.constant 0.000000e+00 : f32
    %148 = vector.broadcast %cst_118 : f32 to vector<8x512xf32>
    %149 = arith.maximumf %147, %148 : vector<8x512xf32>
    %c0_119 = arith.constant 0 : index
    %c0_120 = arith.constant 0 : index
    %150 = vector.load %arg14[%c0_119, %c0_120] : memref<8x512xf32, #tpu.memory_space<vmem>>, vector<8x512xf32>
    tpu.vector_store %arg14[%c0_119, %c0_120], %149 {strides = array<i32>} : memref<8x512xf32, #tpu.memory_space<vmem>>, vector<8x512xf32>,
    return
  }
  func.func @transform_0(%arg0: i32) -> (i32, i32) {
    %c0_i32 = arith.constant 0 : i32
    %c0_i32_0 = arith.constant 0 : i32
    return %c0_i32, %arg0 : i32, i32
  }
  func.func @transform_1(%arg0: i32) -> (i32, i32) {
    %c0_i32 = arith.constant 0 : i32
    %c0_i32_0 = arith.constant 0 : i32
    %c0_i32_1 = arith.constant 0 : i32
    return %c0_i32, %c0_i32_0 : i32, i32
  }
  func.func @transform_2(%arg0: i32) -> (i32, i32) {
    %c0_i32 = arith.constant 0 : i32
    %c0_i32_0 = arith.constant 0 : i32
    %c0_i32_1 = arith.constant 0 : i32
    return %c0_i32, %c0_i32_0 : i32, i32
  }
  func.func @transform_3(%arg0: i32) -> (i32, i32) {
    %c0_i32 = arith.constant 0 : i32
    %c0_i32_0 = arith.constant 0 : i32
    %c0_i32_1 = arith.constant 0 : i32
    return %c0_i32, %c0_i32_0 : i32, i32
  }
  func.func @transform_4(%arg0: i32) -> (i32, i32) {
    %c0_i32 = arith.constant 0 : i32
    %c0_i32_0 = arith.constant 0 : i32
    %c0_i32_1 = arith.constant 0 : i32
    return %c0_i32, %c0_i32_0 : i32, i32
  }
  func.func @transform_5(%arg0: i32) -> (i32, i32) {
    %c0_i32 = arith.constant 0 : i32
    %c0_i32_0 = arith.constant 0 : i32
    %c0_i32_1 = arith.constant 0 : i32
    return %c0_i32, %c0_i32_0 : i32, i32
  }
  func.func @transform_6(%arg0: i32) -> (i32, i32) {
    %c0_i32 = arith.constant 0 : i32
    %c0_i32_0 = arith.constant 0 : i32
    %c0_i32_1 = arith.constant 0 : i32
    return %c0_i32, %c0_i32_0 : i32, i32
  }
  func.func @transform_7(%arg0: i32) -> (i32, i32) {
    %c0_i32 = arith.constant 0 : i32
    %c0_i32_0 = arith.constant 0 : i32
    %c0_i32_1 = arith.constant 0 : i32
    return %c0_i32, %c0_i32_0 : i32, i32
  }
  func.func @transform_8(%arg0: i32) -> (i32, i32) {
    %c0_i32 = arith.constant 0 : i32
    %c0_i32_0 = arith.constant 0 : i32
    %c0_i32_1 = arith.constant 0 : i32
    return %c0_i32, %c0_i32_0 : i32, i32
  }
  func.func @transform_9(%arg0: i32) -> (i32, i32) {
    %c0_i32 = arith.constant 0 : i32
    %c0_i32_0 = arith.constant 0 : i32
    %c0_i32_1 = arith.constant 0 : i32
    return %c0_i32, %c0_i32_0 : i32, i32
  }
  func.func @transform_10(%arg0: i32) -> (i32, i32) {
    %c0_i32 = arith.constant 0 : i32
    %c0_i32_0 = arith.constant 0 : i32
    %c0_i32_1 = arith.constant 0 : i32
    return %c0_i32, %c0_i32_0 : i32, i32
  }
  func.func @transform_11(%arg0: i32) -> (i32, i32) {
    %c0_i32 = arith.constant 0 : i32
    %c0_i32_0 = arith.constant 0 : i32
    %c0_i32_1 = arith.constant 0 : i32
    return %c0_i32, %c0_i32_0 : i32, i32
  }
  func.func @transform_12(%arg0: i32) -> (i32, i32) {
    %c0_i32 = arith.constant 0 : i32
    %c0_i32_0 = arith.constant 0 : i32
    %c0_i32_1 = arith.constant 0 : i32
    return %c0_i32, %c0_i32_0 : i32, i32
  }
  func.func @transform_13(%arg0: i32) -> (i32, i32) {
    %c0_i32 = arith.constant 0 : i32
    %c0_i32_0 = arith.constant 0 : i32
    return %c0_i32, %arg0 : i32, i32
  }
}

</mosaic_0001>

<bundles_post_ra>
// kernel: tpu_custom_call.1
= control target key start
LH: loop header
LB: loop body
LE: loop exit
PB: predicated region body
PF: predicated region fallthrough
CT: control target
= control target key end

     0   :  { %18 = vsyncpa [#allocation5], 0  ;;  %s2480_s0 = inlined_call_operand.vmem [shape: f32[8,512], index: 0, kind: input, shape index: {}]   ;;  %s2481_s1 = inlined_call_operand.hbm [shape: f32[72,512], index: 1, kind: input, shape index: {}]   ;;  %s2482_s2 = inlined_call_operand.vmem [shape: bf16[8,72], index: 2, kind: input, shape index: {}]   ;;  %s2483_s3 = inlined_call_operand.vmem [shape: f32[8,1], index: 3, kind: input, shape index: {}]   ;;  %s2484_s4 = inlined_call_operand.vmem [shape: f32[8,1], index: 4, kind: input, shape index: {}]   ;;  %s2485_s5 = inlined_call_operand.vmem [shape: f32[8,2], index: 5, kind: input, shape index: {}]   ;;  %s2486_s6 = inlined_call_operand.vmem [shape: f32[8,2], index: 6, kind: input, shape index: {}]   ;;  %s2487_s7 = inlined_call_operand.vmem [shape: bf16[8,72], index: 7, kind: input, shape index: {}]   ;;  %s2488_s8 = inlined_call_operand.vmem [shape: f32[8,1], index: 8, kind: input, shape index: {}]   ;;  %s2489_s9 = inlined_call_operand.vmem [shape: f32[8,1], index: 9, kind: input, shape index: {}]   ;;  %s2490_s10 = inlined_call_operand.vmem [shape: bf16[8,72], index: 10, kind: input, shape index: {}]   ;;  %s2491_s11 = inlined_call_operand.vmem [shape: f32[8,1], index: 11, kind: input, shape index: {}]   ;;  %s2492_s12 = inlined_call_operand.vmem [shape: f32[8,1], index: 12, kind: input, shape index: {}]   ;;  %s2493_s13 = inlined_call_operand.hbm [shape: f32[8,512], index: 13, kind: output, shape index: {}]  }
   0x1   :  { %19 = vsyncpa [#allocation6], 0  ;;  %s1740_s25 = smov [#allocation4]   ;;  %s1692_s29 = scalar_lea.hbm %s2481_s1, 4608 }
   0x2   :  { %s27_s26 = sshll.u32 %s1740_s25, 4  ;;  %p1693_p0 = scmp.ne.s32.totalorder %s2481_s1, %s1692_s29  ;;  %s28_s26 = int_to_ptr.vmem [resolvable:$true] %s27_s26 }
   0x3   :  { %p1696_p1 = scmp.lt.u32.totalorder %s1692_s29, %s2481_s1 }
   0x5   :  { %p1698_p2 = pnand %p1696_p1, %p1693_p0 }
   0x7   :  { %1701 = shalt.err (!%p1698_p2)
}
   0x8   :  { %s1702_s17 = scalar_lea.vmem %s28_s26, 4608  ;;  %p1707_p4 = scmp.lt.s32.totalorder %s28_s26, %s28_s26 }
   0x9   :  { %p1703_p3 = scmp.ne.s32.totalorder %s28_s26, %s1702_s17  ;;  %p1708_p5 = scmp.lt.s32.totalorder %s1702_s17, %s1702_s17 }
   0xb   :  { %p1709_p6 = por %p1708_p5, %p1707_p4 }
   0xd   :  { %p1710_p7 = pnand %p1709_p6, %p1703_p3 }
   0xf   :  { %1713 = shalt.err (!%p1710_p7)
}
  0x10   :  { %s1741_s18 = smov 512   ;;  %s1742_s19 = smov 32  }
  0x11   :  { %33 = dma.hbm_to_vmem [thread:$0]  %s2481_s1, 4608, %s28_s26, [#allocation5], %s1741_s18, %s1741_s18, %s1742_s19  }
  0x12   :  { %1736 = dma.done.wait [#allocation5], 4608  }
  0x13   :  { %1737 = vsyncadd [#allocation5], 4294962688  ;;  %v1838_v0 = vld [vmem:[%s2480_s0] sm:$0xff]  ;;  %v1843_v1 = vld [vmem:[%s2480_s0 + $0x8] sm:$0xff]  ;;  %s1743_s29 = smov 16   ;;  %s1744_s30 = smov 17   ;;  %v147_v10 = vlaneseq }
  0x14   :  { %v1848_v2 = vld [vmem:[%s2480_s0 + $0x10] sm:$0xff]  ;;  %v1452_v3 = vpack.i.bf16 %v1843_v1, %v1838_v0  ;;  %v1855_v4 = vld [vmem:[%s2480_s0 + $0x18] sm:$0xff]  ;;  %s1745_s14 = smov 15   ;;  %s1746_s0 = smov 1   ;;  %v1750_v6 = vmov 0   ;;  %v496_v7 = vadd.f32 %v1843_v1, %v1838_v0  ;;  %v137_v9 = vld [vmem:[%s2483_s3] sm:$0xff] }
  0x15   :  { %v1457_v5 = vpack.i.bf16 %v1855_v4, %v1848_v2  ;;  %s1747_s15 = smov 127   ;;  %s1748_s16 = smov 113   ;;  %422 = vmatprep.mubr.bf16.mxu0 %v1750_v6  ;;  %463 = vmatprep.mubr.bf16.mxu1 %v1750_v6  ;;  %v527_v8 = vadd.f32 %v1855_v4, %v1848_v2  ;;  %v65_v11 = vld [vmem:[#allocation4 + $0x8] sm:$0xff]  ;;  %v1886_v13 = vand.u32 127, %v147_v10  ;;  %v64_v14 = vld [vmem:[#allocation4] sm:$0xff]  ;;  %v67_v16 = vld [vmem:[#allocation4 + $0x18] sm:$0xff] }
  0x16   :  { %1453 = vrot.lane.b32.xlu1 %v1452_v3, %s1743_s29  ;;  %1443 = vrot.lane.b32.xlu0 %v1452_v3, %s1744_s30  ;;  %s1749_s17 = smov 112   ;;  %s1751_s18 = smov 111   ;;  %v69_v12 = vld [vmem:[#allocation4 + $0x28] sm:$0xff]  ;;  %v68_v15 = vld [vmem:[#allocation4 + $0x20] sm:$0xff]  ;;  %vm101_vm0 = vcmp.gt.f32.partialorder %v65_v11, 0.5  ;;  %v71_v17 = vld [vmem:[#allocation4 + $0x38] sm:$0xff] }
  0x17   :  { %1522 = vset.pattern.permute.xlu1 %v1750_v6  ;;  %1523 = vset.pattern.permute.xlu0 %v1750_v6  ;;  %vm105_vm1 = vcmp.gt.f32.partialorder %v69_v12, 0.5  ;;  %vm2495_vm2 = vcmp.lt.s32.totalorder %v1886_v13, 17  ;;  %vm2494_vm3 = vcmp.lt.s32.totalorder %v1886_v13, 16  ;;  %vm100_vm4 = vcmp.gt.f32.partialorder %v64_v14, 0.5  ;;  %v66_v20 = vld [vmem:[#allocation4 + $0x10] sm:$0xff]  ;;  %v73_v26 = vld [vmem:[#allocation4 + $0x48] sm:$0xff] }
  0x18   :  { %vm104_vm5 = vcmp.gt.f32.partialorder %v68_v15, 0.5  ;;  %v70_v21 = vld [vmem:[#allocation4 + $0x30] sm:$0xff]  ;;  %v77_v27 = vld [vmem:[#allocation4 + $0x68] sm:$0xff]  ;;  %vm1892_vm6 = vmpackc.low %vm105_vm1, %vm101_vm0  ;;  %vm103_vm7 = vcmp.gt.f32.partialorder %v67_v16, 0.5  ;;  %vm107_vm8 = vcmp.gt.f32.partialorder %v71_v17, 0.5  ;;  %vm102_vm10 = vcmp.gt.f32.partialorder %v66_v20, 0.5 }
  0x19   :  { %vm106_vm11 = vcmp.gt.f32.partialorder %v70_v21, 0.5  ;;  %v75_v31 = vld [vmem:[#allocation4 + $0x58] sm:$0xff]  ;;  %v1901_v33 = vld [vmem:[#allocation4 + $0x40] sm:$0xff]  ;;  %vm1905_vm12 = vmpackc.low %vm104_vm5, %vm100_vm4  ;;  %vm109_vm14 = vcmp.gt.f32.partialorder %v73_v26, 0.5  ;;  %vm113_vm15 = vcmp.gt.f32.partialorder %v77_v27, 0.5  ;;  %v2520_v50 = vmov 0 }
  0x1a   :  { %1458 = vrot.lane.b32.xlu1 %v1457_v5, %s1743_s29  ;;  %1448 = vrot.lane.b32.xlu0 %v1457_v5, %s1744_s30  ;;  %v79_v32 = vld [vmem:[#allocation4 + $0x78] sm:$0xff]  ;;  %vm1912_vm0 = vmpackc.low %vm107_vm8, %vm103_vm7  ;;  %vm111_vm1 = vcmp.gt.f32.partialorder %v75_v31, 0.5  ;;  %v76_v43 = vld [vmem:[#allocation4 + $0x60] sm:$0xff]  ;;  %v2524_v15 = vmov 0  ;;  %v2528_v20 = vmov 0  ;;  %v2544_v31 = vmov 0 }
  0x1b   :  { %vm115_vm4 = vcmp.gt.f32.partialorder %v79_v32, 0.5  ;;  %v74_v44 = vld [vmem:[#allocation4 + $0x50] sm:$0xff]  ;;  %vm1929_vm7 = vmpackc.low %vm106_vm11, %vm102_vm10  ;;  %v81_v51 = vld [vmem:[#allocation4 + $0x88] sm:$0xff]  ;;  %vm2526_vm11 = vcmp.gt.f32.partialorder %v1901_v33, 0.5  ;;  %vm2527_vm13 = vcmp.gt.f32.partialorder %v76_v43, 0.5 }
  0x1c   :  { %v78_v45 = vld [vmem:[#allocation4 + $0x70] sm:$0xff]  ;;  %v2521_v50 = vsel %vm1929_vm7, 4294967295, %v2520_v50  ;;  %v85_v52 = vld [vmem:[#allocation4 + $0xa8] sm:$0xff]  ;;  %v83_v59 = vld [vmem:[#allocation4 + $0x98] sm:$0xff] }
  0x1d   :  { %v87_v60 = vld [vmem:[#allocation4 + $0xb8] sm:$0xff]  ;;  %v80_v61 = vld [vmem:[#allocation4 + $0x80] sm:$0xff]  ;;  %vm1952_vm9 = vmpackc.low %vm115_vm4, %vm111_vm1  ;;  %vm2530_vm1 = vcmp.lt.s32.totalorder %v1886_v13, 15  ;;  %vm2535_vm10 = vcmp.gt.f32.partialorder %v78_v45, 0.5  ;;  %v2552_v45 = vmov 0 }
  0x1e   :  { %1468 = vrot.lane.b32.xlu1 %v1457_v5, %s1745_s14  ;;  %1463 = vrot.lane.b32.xlu0 %v1452_v3, %s1745_s14  ;;  %v84_v63 = vld [vmem:[#allocation4 + $0xa0] sm:$0xff]  ;;  %v2525_v15 = vsel %vm1952_vm9, 4294967295, %v2524_v15  ;;  %vm1959_vm8 = vmpackc.low %vm2527_vm13, %vm2526_vm11  ;;  %vm2538_vm13 = vcmp.lt.s32.totalorder %v1886_v13, 1 }
  0x1f   :  { %v2529_v20 = vsel %vm1959_vm8, 4294967295, %v2528_v20  ;;  %vm2531_vm4 = vmmov %vm2530_vm1 }
  0x20   :  { %vm2533_vm5 = vmmov %vm2530_vm1 }
  0x21   :  { %vm2539_vm11 = vmmov %vm2538_vm13 }
  0x22   :  { %1478 = vrot.lane.b32.xlu1 %v1457_v5, %s1746_s0  ;;  %1473 = vrot.lane.b32.xlu0 %v1452_v3, %s1746_s0 }
  0x26   :  { %1488 = vrot.lane.b32.xlu1 %v1457_v5, %s1747_s15  ;;  %1483 = vrot.lane.b32.xlu0 %v1452_v3, %s1747_s15 }
  0x2a   :  { %1498 = vrot.lane.b32.xlu1 %v1457_v5, %s1748_s16  ;;  %1493 = vrot.lane.b32.xlu0 %v1452_v3, %s1748_s16 }
  0x2e   :  { %1508 = vrot.lane.b32.xlu1 %v1457_v5, %s1749_s17  ;;  %1503 = vrot.lane.b32.xlu0 %v1452_v3, %s1749_s17 }
  0x32   :  { %1518 = vrot.lane.b32.xlu1 %v1457_v5, %s1751_s18  ;;  %1513 = vrot.lane.b32.xlu0 %v1452_v3, %s1751_s18  ;;  %v82_v3 = vld [vmem:[#allocation4 + $0x90] sm:$0xff] }
  0x33   :  { %v86_v5 = vld [vmem:[#allocation4 + $0xb0] sm:$0xff] }
  0x51   :  { %497 = vadd.xlane.f32.xlu0 %v496_v7 }
  0x56   :  { %528 = vadd.xlane.f32.xlu1 %v527_v8 }
  0x67   :  { %474 = vperm.xlu1 %1522, %v137_v9  }
  0x88   :  { %v1454_v18 = vpop.permute.xlu1 %1453  ;;  %v1444_v19 = vpop.permute.xlu0 %1443 }
  0x89   :  { %v1456_v22 = vunpack.i.h.bf16 %v1454_v18  ;;  %v1455_v23 = vunpack.i.l.bf16 %v1454_v18  ;;  %v1446_v24 = vunpack.i.h.bf16 %v1444_v19  ;;  %v1445_v25 = vunpack.i.l.bf16 %v1444_v19 }
  0x8b   :  { %v152_v29 = vsel %vm2495_vm2, %v1445_v25, %v1446_v24  ;;  %v169_v30 = vsel %vm2494_vm3, %v1455_v23, %v1456_v22 }
  0x8c   :  { %v1459_v34 = vpop.permute.xlu1 %1458  ;;  %v1449_v35 = vpop.permute.xlu0 %1448  ;;  %v1272_v36 = vpack.c.bf16 %v169_v30, %v152_v29 }
  0x8d   :  { %v1461_v38 = vunpack.i.h.bf16 %v1459_v34  ;;  %v1460_v39 = vunpack.i.l.bf16 %v1459_v34  ;;  %v1451_v40 = vunpack.i.h.bf16 %v1449_v35  ;;  %v1450_v41 = vunpack.i.l.bf16 %v1449_v35 }
  0x8e   :  { %1273 = vmatprep.subr.msk.bf16.mxu0 %vm1892_vm6, %v1272_v36 }
  0x8f   :  { %v153_v46 = vsel %vm2495_vm2, %v1451_v40, %v1445_v25  ;;  %v170_v47 = vsel %vm2494_vm3, %v1461_v38, %v1455_v23  ;;  %v150_v48 = vsel %vm2495_vm2, %v1450_v41, %v1451_v40  ;;  %v167_v49 = vsel %vm2494_vm3, %v1460_v39, %v1461_v38 }
  0x90   :  { %v1469_v53 = vpop.permute.xlu1 %1468  ;;  %v1464_v54 = vpop.permute.xlu0 %1463  ;;  %v1275_v55 = vpack.c.bf16 %v170_v47, %v153_v46  ;;  %v1298_v56 = vpack.c.bf16 %v167_v49, %v150_v48  ;;  %v151_v57 = vsel %vm2495_vm2, %v1446_v24, %v1450_v41  ;;  %v168_v58 = vsel %vm2494_vm3, %v1456_v22, %v1460_v39  ;;  %vm1944_vm3 = vmpackc.low %vm113_vm15, %vm109_vm14  ;;  %v2009_v46 = vld [vmem:[#allocation4 + $0x108] sm:$0xff] }
  0x91   :  { %v1471_v62 = vunpack.i.h.bf16 %v1469_v53  ;;  %v1470_v7 = vunpack.i.l.bf16 %v1469_v53  ;;  %v1466_v8 = vunpack.i.h.bf16 %v1464_v54  ;;  %v1465_v9 = vunpack.i.l.bf16 %v1464_v54  ;;  %vm2532_vm15 = vmmov %vm2530_vm1  ;;  %v89_v47 = vld [vmem:[#allocation4 + $0xc8] sm:$0xff] }
  0x92   :  { %1276 = vmatpush1.bf16.msk.msra.mxu0 %vm1905_vm12, %v1275_v55  ;;  %1299 = vmatprep.subr.msk.bf16.mxu1 %vm1912_vm0, %v1298_v56  ;;  %v1301_v10 = vpack.c.bf16 %v168_v58, %v151_v57  ;;  %vm2534_vm14 = vcmp.gt.f32.partialorder %v74_v44, 0.5  ;;  %v2536_v25 = vmov 0  ;;  %v2548_v39 = vmov 0  ;;  %v93_v48 = vld [vmem:[#allocation4 + $0xe8] sm:$0xff]  ;;  %v2027_v55 = vld [vmem:[#allocation4 + $0x118] sm:$0xff] }
  0x93   :  { %v184_v21 = vsel %vm2530_vm1, %v1470_v7, %v1471_v62  ;;  %v185_v22 = vsel %vm2531_vm4, %v1466_v8, %v1470_v7  ;;  %v186_v23 = vsel %vm2532_vm15, %v1465_v9, %v1466_v8  ;;  %v187_v24 = vsel %vm2533_vm5, %v1471_v62, %v1465_v9  ;;  %vm1973_vm2 = vmpackc.low %vm2535_vm10, %vm2534_vm14  ;;  %v91_v56 = vld [vmem:[#allocation4 + $0xd8] sm:$0xff]  ;;  %v90_v7 = vld [vmem:[#allocation4 + $0xd0] sm:$0xff] }
  0x94   :  { %1302 = vmatpush1.bf16.msk.msra.mxu1 %vm1929_vm7, %v1301_v10  ;;  %v1479_v12 = vpop.permute.xlu1 %1478  ;;  %v1474_v14 = vpop.permute.xlu0 %1473  ;;  %v2537_v25 = vsel %vm1973_vm2, 4294967295, %v2536_v25  ;;  %vm2540_vm1 = vmmov %vm2539_vm11  ;;  %vm2542_vm4 = vcmp.gt.f32.partialorder %v81_v51, 0.5  ;;  %vm2543_vm5 = vcmp.gt.f32.partialorder %v85_v52, 0.5  ;;  %vm2546_vm10 = vcmp.gt.f32.partialorder %v83_v59, 0.5  ;;  %v94_v8 = vld [vmem:[#allocation4 + $0xf0] sm:$0xff] }
  0x95   :  { %v1481_v16 = vunpack.i.h.bf16 %v1479_v12  ;;  %v1480_v17 = vunpack.i.l.bf16 %v1479_v12  ;;  %v1476_v18 = vunpack.i.h.bf16 %v1474_v14  ;;  %v1475_v19 = vunpack.i.l.bf16 %v1474_v14  ;;  %vm2541_vm15 = vmmov %vm2540_vm1  ;;  %v2037_v9 = vld [vmem:[#allocation4 + $0x110] sm:$0xff] }
  0x96   :  { %vm1987_vm7 = vmpackc.low %vm2543_vm5, %vm2542_vm4  ;;  %vm2547_vm14 = vcmp.gt.f32.partialorder %v87_v60, 0.5  ;;  %vm2558_vm5 = vcmp.gt.f32.partialorder %v82_v3, 0.5  ;;  %vm2559_vm4 = vcmp.gt.f32.partialorder %v86_v5, 0.5  ;;  %v2560_v54 = vmov 0  ;;  %v88_v3 = vld [vmem:[#allocation4 + $0xc0] sm:$0xff] }
  0x97   :  { %v201_v26 = vsel %vm2538_vm13, %v1480_v17, %v1481_v16  ;;  %v202_v27 = vsel %vm2539_vm11, %v1476_v18, %v1480_v17  ;;  %v203_v29 = vsel %vm2540_vm1, %v1475_v19, %v1476_v18  ;;  %v204_v30 = vsel %vm2541_vm15, %v1481_v16, %v1475_v19  ;;  %vm1993_vm13 = vmpackc.low %vm2547_vm14, %vm2546_vm10  ;;  %v92_v5 = vld [vmem:[#allocation4 + $0xe0] sm:$0xff] }
  0x98   :  { %v2545_v31 = vsel %vm1987_vm7, 4294967295, %v2544_v31  ;;  %v1304_v32 = vpack.c.bf16 %v201_v26, %v184_v21  ;;  %v1278_v33 = vpack.c.bf16 %v203_v29, %v186_v23  ;;  %v1281_v34 = vpack.c.bf16 %v204_v30, %v187_v24  ;;  %v1489_v36 = vpop.permute.xlu1 %1488  ;;  %v1484_v38 = vpop.permute.xlu0 %1483 }
  0x99   :  { %v1307_v35 = vpack.c.bf16 %v202_v27, %v185_v22  ;;  %v2549_v39 = vsel %vm1993_vm13, 4294967295, %v2548_v39  ;;  %v1491_v40 = vunpack.i.h.bf16 %v1489_v36  ;;  %v1490_v41 = vunpack.i.l.bf16 %v1489_v36 }
  0x9a   :  { %v1486_v43 = vunpack.i.h.bf16 %v1484_v38  ;;  %v1485_v44 = vunpack.i.l.bf16 %v1484_v38  ;;  %vm2550_vm11 = vcmp.gt.f32.partialorder %v80_v61, 0.5  ;;  %vm2551_vm1 = vcmp.gt.f32.partialorder %v84_v63, 0.5  ;;  %1279 = vmatprep.subr.msk.bf16.mxu0 %vm1944_vm3, %v1278_v33  ;;  %1305 = vmatprep.subr.msk.bf16.mxu1 %vm1952_vm9, %v1304_v32  ;;  %vm2023_vm9 = vmpackc.low %vm2559_vm4, %vm2558_vm5  ;;  %v95_v63 = vld [vmem:[#allocation4 + $0xf8] sm:$0xff] }
  0x9b   :  { %vm1999_vm15 = vmpackc.low %vm2551_vm1, %vm2550_vm11  ;;  %vm2554_vm10 = vcmp.lt.s32.totalorder %v1886_v13, 127  ;;  %1282 = vmatpush1.bf16.msk.msra.mxu0 %vm1959_vm8, %v1281_v34  ;;  %v2561_v54 = vsel %vm2023_vm9, 4294967295, %v2560_v54  ;;  %1308 = vmatpush1.bf16.msk.msra.mxu1 %vm1973_vm2, %v1307_v35  ;;  %vm2566_vm4 = vcmp.lt.s32.totalorder %v1886_v13, 113 }
  0x9c   :  { %v2553_v45 = vsel %vm1999_vm15, 4294967295, %v2552_v45  ;;  %v222_v49 = vsel %vm2554_vm10, %v1490_v41, %v1491_v40  ;;  %vm2555_vm14 = vmmov %vm2554_vm10  ;;  %v1499_v61 = vpop.permute.xlu1 %1498  ;;  %v1494_v62 = vpop.permute.xlu0 %1493 }
  0x9d   :  { %v223_v51 = vsel %vm2555_vm14, %v1486_v43, %v1490_v41  ;;  %vm2556_vm11 = vmmov %vm2554_vm10  ;;  %v1313_v57 = vpack.c.bf16 %v222_v49, %v1848_v2  ;;  %v1501_v10 = vunpack.i.h.bf16 %v1499_v61  ;;  %v1500_v12 = vunpack.i.l.bf16 %v1499_v61 }
  0x9e   :  { %v224_v52 = vsel %vm2556_vm11, %v1485_v44, %v1486_v43  ;;  %vm2557_vm1 = vmmov %vm2554_vm10  ;;  %v1284_v58 = vpack.c.bf16 %v223_v51, %v1843_v1  ;;  %v1496_v14 = vunpack.i.h.bf16 %v1494_v62  ;;  %v1495_v16 = vunpack.i.l.bf16 %v1494_v62 }
  0x9f   :  { %v225_v53 = vsel %vm2557_vm1, %v1491_v40, %v1485_v44  ;;  %v1287_v59 = vpack.c.bf16 %v224_v52, %v1838_v0  ;;  %vm127_vm1 = vcmp.gt.f32.partialorder %v91_v56, 0.5  ;;  %v239_v26 = vsel %vm2566_vm4, %v1500_v12, %v1501_v10  ;;  %vm2567_vm5 = vmmov %vm2566_vm4  ;;  %v2083_v40 = vld [vmem:[#allocation4 + $0x100] sm:$0xff] }
  0xa0   :  { %v1310_v60 = vpack.c.bf16 %v225_v53, %v1855_v4  ;;  %1285 = vmatprep.subr.msk.bf16.mxu0 %vm1987_vm7, %v1284_v58  ;;  %v1509_v17 = vpop.permute.xlu1 %1508  ;;  %v1504_v18 = vpop.permute.xlu0 %1503  ;;  %v240_v27 = vsel %vm2567_vm5, %v1496_v14, %v1500_v12  ;;  %vm2568_vm2 = vmmov %vm2566_vm4  ;;  %vm2570_vm10 = vcmp.gt.f32.partialorder %v95_v63, 0.5  ;;  %vm2577_vm5 = vcmp.gt.f32.partialorder %v88_v3, 0.5 }
  0xa1   :  { %1288 = vmatpush1.bf16.msk.msra.mxu0 %vm1999_vm15, %v1287_v59  ;;  %v1511_v19 = vunpack.i.h.bf16 %v1509_v17  ;;  %v1510_v21 = vunpack.i.l.bf16 %v1509_v17  ;;  %v1506_v22 = vunpack.i.h.bf16 %v1504_v18  ;;  %v1505_v23 = vunpack.i.l.bf16 %v1504_v18  ;;  %vm2569_vm7 = vmmov %vm2568_vm2  ;;  %v136_v17 = vld [vmem:[%s2482_s2] sm:$0xf] }
  0xa2   :  { %1311 = vmatprep.subr.msk.bf16.mxu1 %vm1993_vm13, %v1310_v60  ;;  %vm2562_vm15 = vcmp.gt.f32.partialorder %v89_v47, 0.5  ;;  %vm2563_vm13 = vcmp.gt.f32.partialorder %v93_v48, 0.5  ;;  %v241_v29 = vsel %vm2568_vm2, %v1495_v16, %v1496_v14  ;;  %v242_v30 = vsel %vm2569_vm7, %v1501_v10, %v1495_v16  ;;  %vm2065_vm14 = vmpackc.low %vm2570_vm10, %vm127_vm1  ;;  %v494_v18 = vld [vmem:[%s2485_s5] sm:$0xff] }
  0xa3   :  { %1314 = vmatpush1.bf16.msk.msra.mxu1 %vm2023_vm9, %v1313_v57  ;;  %vm2051_vm11 = vmpackc.low %vm2563_vm13, %vm2562_vm15  ;;  %vm2573_vm13 = vcmp.lt.s32.totalorder %v1886_v13, 112  ;;  %vm2578_vm7 = vcmp.gt.f32.partialorder %v92_v5, 0.5  ;;  %vm2581_vm10 = vcmp.gt.f32.partialorder %v90_v7, 0.5  ;;  %vm2582_vm1 = vcmp.gt.f32.partialorder %v94_v8, 0.5 }
  0xa4   :  { %v256_v33 = vsel %vm2573_vm13, %v1510_v21, %v1511_v19  ;;  %vm2574_vm15 = vmmov %vm2573_vm13  ;;  %v1519_v48 = vpop.permute.xlu1 %1518  ;;  %v1514_v49 = vpop.permute.xlu0 %1513 }
  0xa5   :  { %v257_v34 = vsel %vm2574_vm15, %v1506_v22, %v1510_v21  ;;  %vm2575_vm4 = vmmov %vm2573_vm13  ;;  %v1319_v41 = vpack.c.bf16 %v256_v33, %v239_v26  ;;  %v1521_v52 = vunpack.i.h.bf16 %v1519_v48  ;;  %v1520_v53 = vunpack.i.l.bf16 %v1519_v48 }
  0xa6   :  { %v258_v35 = vsel %vm2575_vm4, %v1505_v23, %v1506_v22  ;;  %vm2576_vm2 = vmmov %vm2575_vm4  ;;  %v1290_v43 = vpack.c.bf16 %v257_v34, %v240_v27  ;;  %v1516_v56 = vunpack.i.h.bf16 %v1514_v49  ;;  %v1515_v57 = vunpack.i.l.bf16 %v1514_v49  ;;  %v495_v49 = vld [vmem:[%s2486_s6] sm:$0xff] }
  0xa7   :  { %v259_v36 = vsel %vm2576_vm2, %v1511_v19, %v1505_v23  ;;  %vm2079_vm9 = vmpackc.low %vm2578_vm7, %vm2577_vm5  ;;  %v1293_v44 = vpack.c.bf16 %v258_v35, %v241_v29  ;;  %vm2512_vm15 = vcmp.gt.f32.partialorder %v2083_v40, 0.5  ;;  %vm2585_vm4 = vcmp.lt.s32.totalorder %v1886_v13, 111 }
  0xa8   :  { %v1316_v47 = vpack.c.bf16 %v259_v36, %v242_v30  ;;  %vm2087_vm13 = vmpackc.low %vm2582_vm1, %vm2581_vm10  ;;  %1291 = vmatprep.subr.msk.bf16.mxu0 %vm2051_vm11, %v1290_v43  ;;  %v274_v58 = vsel %vm2585_vm4, %v1516_v56, %v1520_v53  ;;  %vm2511_vm5 = vcmask 1043456   ;;  %vm2588_vm10 = vcmp.gt.f32.partialorder %v2009_v46, 0.5 }
  0xa9   :  { %vm2586_vm2 = vmmov %vm2585_vm4  ;;  %1294 = vmatpush1.bf16.msk.msra.mxu0 %vm2079_vm9, %v1293_v44  ;;  %v350_v61 = vsel %vm2588_vm10, %v274_v58, 0.0  ;;  %vm2589_vm1 = vcmp.gt.f32.partialorder %v2027_v55, 0.5  ;;  %vm2590_vm4 = vcmp.gt.f32.partialorder %v2037_v9, 0.5  ;;  %vm502_vm10 = vcmask 15360  }
  0xaa   :  { %1317 = vmatprep.subr.msk.bf16.mxu1 %vm2065_vm14, %v1316_v47  ;;  %v276_v59 = vsel %vm2586_vm2, %v1521_v52, %v1515_v57  ;;  %vm2587_vm7 = vmmov %vm2586_vm2  ;;  %v275_v3 = vsel %vm2586_vm2, %v1515_v57, %v1516_v56  ;;  %v370_v5 = vpack.c.bf16 %v350_v61, %v350_v61 }
  0xab   :  { %1320 = vmatpush1.bf16.msk.msra.mxu1 %vm2087_vm13, %v1319_v41  ;;  %v273_v60 = vsel %vm2587_vm7, %v1520_v53, %v1521_v52  ;;  %v352_v62 = vsel %vm2589_vm1, %v276_v59, 0.0  ;;  %v349_v10 = vsel %vm2512_vm15, %v275_v3, 0.0  ;;  %vm2510_vm7 = vcmask 588800  }
  0xac   :  { %v351_v63 = vsel %vm2590_vm4, %v273_v60, 0.0  ;;  %v372_v7 = vpack.c.bf16 %v352_v62, %v352_v62  ;;  %v369_v12 = vpack.c.bf16 %v349_v10, %v349_v10  ;;  %1295 = vmatprep.subr.msk.bf16.mxu0 %vm2511_vm5, %v370_v5  ;;  %vm2591_vm1 = vcmp.lt.s32.totalorder %v1886_v13, 17 }
  0xad   :  { %v371_v8 = vpack.c.bf16 %v351_v63, %v351_v63  ;;  %v138_v63 = vld [vmem:[%s2484_s4] sm:$0xff]  ;;  %vm2592_vm4 = vcmp.lt.s32.totalorder %v1886_v13, 16  ;;  %vm2593_vm2 = vmmov %vm2591_vm1 }
  0xae   :  { %1321 = vmatprep.subr.msk.bf16.mxu1 %vm2511_vm5, %v372_v7  ;;  %v379_v16 = vsel %vm2511_vm5, %v369_v12, 0 }
  0xaf   :  { %v385_v14 = vsel %vm2511_vm5, %v371_v8, 0  ;;  %399 = vmatpush1.bf16.msra.mxu0 %v379_v16 }
  0xb0   :  { %440 = vmatpush1.bf16.msra.mxu1 %v385_v14 }
  0xb2   :  { %1296 = vmatmul.mubr.msk.bf16.vlgmr.msra.gmra.mrb[0].mxu0 %vm2510_vm7, %v136_v17 }
  0xb3   :  { %1322 = vmatmul.mubr.msk.bf16.vlgmr.msra.gmra.mrb[0].mxu1 %vm2510_vm7, %v136_v17  ;;  %834 = vmatprep.mubr.bf16.mxu0 %v1750_v6  ;;  %vm2595_vm7 = vmmov %vm2591_vm1 }
  0xb4   :  { %875 = vmatprep.mubr.bf16.mxu1 %v1750_v6 }
  0xde   :  { %v498_v19 = vpop.xlane.xlu0 %497 }
  0xdf   :  { %v500_v21 = vmul.f32 0.00390625, %v498_v19 }
  0xe1   :  { %v501_v22 = vmul.f32 %v500_v21, %v494_v18 }
  0xe3   :  { %v503_v23 = vsel %vm502_vm10, %v501_v22, 0.0  ;;  %v529_v26 = vpop.xlane.xlu1 %528 }
  0xe4   :  { %v504_v27 = vrot.slane %v503_v23, 4  ;;  %v530_v29 = vmul.f32 0.00390625, %v529_v26 }
  0xe6   :  { %v505_v30 = vadd.f32 %v504_v27, %v503_v23  ;;  %v531_v33 = vmul.f32 %v530_v29, %v494_v18 }
  0xe7   :  { %v475_v26 = vpop.permute.xlu1 %474 }
  0xe8   :  { %v506_v34 = vrot.slane %v505_v30, 2  ;;  %v532_v35 = vsel %vm502_vm10, %v531_v33, 0.0 }
  0xe9   :  { %v533_v36 = vrot.slane %v532_v35, 4 }
  0xea   :  { %v507_v41 = vadd.f32 %v506_v34, %v505_v30 }
  0xeb   :  { %v534_v43 = vadd.f32 %v533_v36, %v532_v35 }
  0xec   :  { %v508_v44 = vrot.slane %v507_v41, 1 }
  0xed   :  { %v535_v47 = vrot.slane %v534_v43, 2 }
  0xee   :  { %v509_v48 = vadd.f32 %v508_v44, %v507_v41 }
  0xef   :  { %v536_v52 = vadd.f32 %v535_v47, %v534_v43 }
  0xf0   :  { %v510_v53 = vmax.f32 %v509_v48, 0.0 }
  0xf1   :  { %v537_v56 = vrot.slane %v536_v52, 1 }
  0xf2   :  { %v511_v57 = vmul.f32 %v510_v53, %v495_v49 }
  0xf3   :  { %v538_v58 = vadd.f32 %v537_v56, %v536_v52 }
  0xf4   :  { %v512_v59 = vsel %vm502_vm10, %v511_v57, 0.0 }
  0xf5   :  { %513 = vadd.xlane.f32.xlu0 %v512_v59  ;;  %v539_v60 = vmax.f32 %v538_v58, 0.0 }
  0xf7   :  { %v540_v61 = vmul.f32 %v539_v60, %v495_v49 }
  0xf9   :  { %v541_v62 = vsel %vm502_vm10, %v540_v61, 0.0  ;;  %vm2594_vm10 = vmmov %vm2591_vm1 }
  0xfa   :  { %542 = vadd.xlane.f32.xlu0 %v541_v62 }
 0x110   :  { %483 = vperm.xlu0 %1523, %v138_v63  }
 0x182   :  { %v514_v3 = vpop.xlane.xlu0 %513 }
 0x183   :  { %v1323_v7 = vmul.f32 -1.442695, %v514_v3 }
 0x185   :  { %v424_v8 = vpop.f32.mrb[0].mxu0  ;;  %1684 = vpow2.f32 %v1323_v7 }
 0x186   :  { %v465_v5 = vpop.f32.mrb[0].mxu1  ;;  %v426_v12 = vpop.f32.mrb[1].mxu0  ;;  %v477_v27 = vmul.f32 %v475_v26, %v424_v8 }
 0x187   :  { %v467_v10 = vpop.f32.mrb[1].mxu1  ;;  %v428_v16 = vpop.f32.mrb[2].mxu0  ;;  %v478_v29 = vmul.f32 %v475_v26, %v426_v12  ;;  %v479_v41 = vmul.f32 %v475_v26, %v465_v5 }
 0x188   :  { %v469_v14 = vpop.f32.mrb[2].mxu1  ;;  %v429_v18 = vpop.f32.mrb[3].mxu0  ;;  %v480_v43 = vmul.f32 %v475_v26, %v467_v10 }
 0x189   :  { %v470_v17 = vpop.f32.mrb[3].mxu1  ;;  %v543_v19 = vpop.xlane.xlu0 %542 }
 0x18a   :  { %v1324_v21 = vmul.f32 -1.442695, %v543_v19 }
 0x18c   :  { %1686 = vpow2.f32 %v1324_v21 }
 0x18f   :  { %v1685_v22 = vpop.eup %1684  ;;  %v484_v33 = vpop.permute.xlu0 %483 }
 0x190   :  { %v518_v23 = vadd.f32 1.0, %v1685_v22  ;;  %v486_v35 = vadd.f32 %v484_v33, %v477_v27  ;;  %v487_v36 = vadd.f32 %v484_v33, %v478_v29  ;;  %v488_v53 = vadd.f32 %v484_v33, %v479_v41 }
 0x191   :  { %v489_v56 = vadd.f32 %v484_v33, %v480_v43 }
 0x192   :  { %1688 = vrcp.f32 %v518_v23  ;;  %v490_v44 = vmax.f32 %v486_v35, 0.0  ;;  %v491_v47 = vmax.f32 %v487_v36, 0.0  ;;  %v492_v63 = vmax.f32 %v488_v53, 0.0 }
 0x193   :  { %v493_v3 = vmax.f32 %v489_v56, 0.0 }
 0x196   :  { %v1687_v30 = vpop.eup %1686 }
 0x197   :  { %v547_v34 = vadd.f32 1.0, %v1687_v30 }
 0x199   :  { %1690 = vrcp.f32 %v547_v34 }
 0x19c   :  { %v1689_v48 = vpop.eup %1688 }
 0x19d   :  { %v521_v49 = vmul.f32 %v1689_v48, %v1838_v0  ;;  %v522_v52 = vmul.f32 %v1689_v48, %v1843_v1 }
 0x19f   :  { %v2142_v57 = vmul.f32 %v521_v49, %v490_v44  ;;  %v2144_v58 = vmul.f32 %v522_v52, %v491_v47 }
 0x1a1   :  { %v1564_v60 = vpack.i.bf16 %v2144_v58, %v2142_v57 }
 0x1a3   :  { %v1691_v59 = vpop.eup %1690  ;;  %1565 = vrot.lane.b32.xlu0 %v1564_v60, %s1747_s15  ;;  %1525 = vrot.lane.b32.xlu1 %v1564_v60, %s1744_s30 }
 0x1a4   :  { %v550_v61 = vmul.f32 %v1691_v59, %v1848_v2  ;;  %v551_v62 = vmul.f32 %v1691_v59, %v1855_v4  ;;  %v561_v2 = vld [vmem:[%s2488_s8] sm:$0xff] }
 0x1a5   :  { %v562_v4 = vld [vmem:[%s2489_s9] sm:$0xff] }
 0x1a6   :  { %v2152_v0 = vmul.f32 %v550_v61, %v492_v63  ;;  %v2154_v1 = vmul.f32 %v551_v62, %v493_v3 }
 0x1a7   :  { %1575 = vrot.lane.b32.xlu0 %v1564_v60, %s1748_s16 }
 0x1a8   :  { %v1529_v5 = vpack.i.bf16 %v2154_v1, %v2152_v0 }
 0x1aa   :  { %1530 = vrot.lane.b32.xlu1 %v1529_v5, %s1744_s30 }
 0x1ab   :  { %1585 = vrot.lane.b32.xlu0 %v1564_v60, %s1749_s17 }
 0x1ae   :  { %1535 = vrot.lane.b32.xlu1 %v1564_v60, %s1743_s29 }
 0x1af   :  { %1595 = vrot.lane.b32.xlu0 %v1564_v60, %s1751_s18 }
 0x1b2   :  { %1540 = vrot.lane.b32.xlu1 %v1529_v5, %s1743_s29 }
 0x1b3   :  { %886 = vperm.xlu0 %1523, %v561_v2  }
 0x1b6   :  { %1545 = vrot.lane.b32.xlu1 %v1564_v60, %s1745_s14 }
 0x1ba   :  { %1550 = vrot.lane.b32.xlu1 %v1529_v5, %s1745_s14 }
 0x1be   :  { %1555 = vrot.lane.b32.xlu1 %v1564_v60, %s1746_s0 }
 0x1c2   :  { %1560 = vrot.lane.b32.xlu1 %v1529_v5, %s1746_s0 }
 0x1c6   :  { %1570 = vrot.lane.b32.xlu1 %v1529_v5, %s1747_s15 }
 0x1ca   :  { %1580 = vrot.lane.b32.xlu1 %v1529_v5, %s1748_s16 }
 0x1ce   :  { %1590 = vrot.lane.b32.xlu1 %v1529_v5, %s1749_s17 }
 0x1d2   :  { %1600 = vrot.lane.b32.xlu1 %v1529_v5, %s1751_s18 }
 0x1d6   :  { %895 = vperm.xlu1 %1522, %v562_v4  }
 0x215   :  { %v1526_v7 = vpop.permute.xlu1 %1525  ;;  %v1566_v27 = vpop.permute.xlu0 %1565 }
 0x216   :  { %v1528_v10 = vunpack.i.h.bf16 %v1526_v7  ;;  %v1527_v12 = vunpack.i.l.bf16 %v1526_v7 }
 0x218   :  { %v573_v21 = vsel %vm2591_vm1, %v1527_v12, %v1528_v10  ;;  %vm2596_vm1 = vmmov %vm2592_vm4 }
 0x219   :  { %vm2598_vm5 = vmmov %vm2596_vm1  ;;  %v2200_v52 = vpop.permute.xlu0 %1575 }
 0x21c   :  { %v1531_v8 = vpop.permute.xlu1 %1530 }
 0x21d   :  { %v1533_v18 = vunpack.i.h.bf16 %v1531_v8  ;;  %v1532_v19 = vunpack.i.l.bf16 %v1531_v8  ;;  %v2204_v61 = vpop.permute.xlu0 %1585 }
 0x21f   :  { %v571_v33 = vsel %vm2593_vm2, %v1532_v19, %v1533_v18  ;;  %v572_v34 = vsel %vm2594_vm10, %v1528_v10, %v1532_v19  ;;  %v574_v35 = vsel %vm2595_vm7, %v1533_v18, %v1527_v12  ;;  %vm2599_vm7 = vnez %v2521_v50 }
 0x220   :  { %v1536_v14 = vpop.permute.xlu1 %1535  ;;  %vm2601_vm2 = vcmp.lt.s32.totalorder %v1886_v13, 1 }
 0x221   :  { %v1538_v16 = vunpack.i.h.bf16 %v1536_v14  ;;  %v1537_v17 = vunpack.i.l.bf16 %v1536_v14  ;;  %v1568_v14 = vunpack.i.h.bf16 %v1566_v27  ;;  %v1596_v19 = vpop.permute.xlu0 %1595  ;;  %vm2606_vm15 = vmmov %vm2601_vm2 }
 0x223   :  { %v589_v22 = vsel %vm2592_vm4, %v1537_v17, %v1538_v16  ;;  %vm2597_vm4 = vmmov %vm2596_vm1 }
 0x224   :  { %v1326_v23 = vpack.c.bf16 %v589_v22, %v573_v21  ;;  %v1541_v26 = vpop.permute.xlu1 %1540 }
 0x225   :  { %v1543_v29 = vunpack.i.h.bf16 %v1541_v26  ;;  %v1542_v30 = vunpack.i.l.bf16 %v1541_v26 }
 0x226   :  { %1327 = vmatprep.subr.msk.bf16.mxu0 %vm1892_vm6, %v1326_v23 }
 0x227   :  { %v587_v36 = vsel %vm2596_vm1, %v1542_v30, %v1543_v29  ;;  %v588_v41 = vsel %vm2597_vm4, %v1538_v16, %v1542_v30  ;;  %v590_v43 = vsel %vm2598_vm5, %v1543_v29, %v1537_v17  ;;  %vm2600_vm5 = vcmp.lt.s32.totalorder %v1886_v13, 15 }
 0x228   :  { %v1329_v44 = vpack.c.bf16 %v590_v43, %v574_v35  ;;  %v1352_v47 = vpack.c.bf16 %v587_v36, %v571_v33  ;;  %v1355_v48 = vpack.c.bf16 %v588_v41, %v572_v34  ;;  %v1546_v49 = vpop.permute.xlu1 %1545  ;;  %v1567_v16 = vunpack.i.l.bf16 %v1566_v27  ;;  %vm2602_vm10 = vmmov %vm2600_vm5 }
 0x229   :  { %v1548_v56 = vunpack.i.h.bf16 %v1546_v49  ;;  %v1547_v59 = vunpack.i.l.bf16 %v1546_v49  ;;  %vm2603_vm1 = vmmov %vm2600_vm5  ;;  %v1598_v41 = vunpack.i.h.bf16 %v1596_v19  ;;  %v1597_v43 = vunpack.i.l.bf16 %v1596_v19 }
 0x22a   :  { %1330 = vmatpush1.bf16.msk.msra.mxu0 %vm1905_vm12, %v1329_v44  ;;  %1353 = vmatprep.subr.msk.bf16.mxu1 %vm1912_vm0, %v1352_v47  ;;  %vm2604_vm4 = vmmov %vm2603_vm1 }
 0x22b   :  { %1356 = vmatpush1.bf16.msk.msra.mxu1 %vm2599_vm7, %v1355_v48  ;;  %v605_v2 = vsel %vm2600_vm5, %v1547_v59, %v1548_v56  ;;  %vm2605_vm5 = vmmov %vm2601_vm2 }
 0x22c   :  { %v1551_v53 = vpop.permute.xlu1 %1550 }
 0x22d   :  { %v1553_v3 = vunpack.i.h.bf16 %v1551_v53  ;;  %v1552_v5 = vunpack.i.l.bf16 %v1551_v53 }
 0x22f   :  { %v603_v17 = vsel %vm2602_vm10, %v1552_v5, %v1553_v3  ;;  %v604_v18 = vsel %vm2603_vm1, %v1548_v56, %v1552_v5  ;;  %v606_v21 = vsel %vm2604_vm4, %v1553_v3, %v1547_v59  ;;  %vm2607_vm10 = vcmp.lt.s32.totalorder %v1886_v13, 127 }
 0x230   :  { %v1556_v60 = vpop.permute.xlu1 %1555  ;;  %v641_v36 = vsel %vm2607_vm10, %v1567_v16, %v1568_v14  ;;  %vm2608_vm1 = vnez %v2525_v15  ;;  %vm2609_vm4 = vmmov %vm2607_vm10  ;;  %vm2613_vm10 = vnez %v2545_v31 }
 0x231   :  { %v1558_v62 = vunpack.i.h.bf16 %v1556_v60  ;;  %v1557_v63 = vunpack.i.l.bf16 %v1556_v60  ;;  %v1341_v60 = vpack.c.bf16 %v641_v36, %v2142_v57  ;;  %v1578_v57 = vunpack.i.h.bf16 %v2200_v52 }
 0x233   :  { %v621_v4 = vsel %vm2601_vm2, %v1557_v63, %v1558_v62 }
 0x234   :  { %v1332_v7 = vpack.c.bf16 %v621_v4, %v605_v2  ;;  %v1561_v8 = vpop.permute.xlu1 %1560 }
 0x235   :  { %v1563_v10 = vunpack.i.h.bf16 %v1561_v8  ;;  %v1562_v12 = vunpack.i.l.bf16 %v1561_v8 }
 0x236   :  { %1333 = vmatprep.subr.msk.bf16.mxu0 %vm1944_vm3, %v1332_v7 }
 0x237   :  { %v619_v22 = vsel %vm2605_vm5, %v1562_v12, %v1563_v10  ;;  %v620_v23 = vsel %vm2601_vm2, %v1558_v62, %v1562_v12  ;;  %v622_v26 = vsel %vm2606_vm15, %v1563_v10, %v1557_v63  ;;  %vm2610_vm15 = vmmov %vm2609_vm4  ;;  %vm2612_vm2 = vnez %v2537_v25 }
 0x238   :  { %v1335_v27 = vpack.c.bf16 %v622_v26, %v606_v21  ;;  %v1358_v29 = vpack.c.bf16 %v619_v22, %v603_v17  ;;  %v1361_v30 = vpack.c.bf16 %v620_v23, %v604_v18  ;;  %v1571_v33 = vpop.permute.xlu1 %1570  ;;  %vm2611_vm5 = vmmov %vm2609_vm4  ;;  %v1588_v62 = vunpack.i.h.bf16 %v2204_v61 }
 0x239   :  { %v1573_v34 = vunpack.i.h.bf16 %v1571_v33  ;;  %v1572_v35 = vunpack.i.l.bf16 %v1571_v33  ;;  %v1587_v63 = vunpack.i.l.bf16 %v2204_v61 }
 0x23a   :  { %1336 = vmatpush1.bf16.msk.msra.mxu0 %vm1959_vm8, %v1335_v27  ;;  %1359 = vmatprep.subr.msk.bf16.mxu1 %vm2608_vm1, %v1358_v29 }
 0x23b   :  { %v642_v44 = vsel %vm2609_vm4, %v1573_v34, %v1567_v16  ;;  %v639_v47 = vsel %vm2610_vm15, %v1572_v35, %v1573_v34  ;;  %v640_v48 = vsel %vm2611_vm5, %v1568_v14, %v1572_v35  ;;  %1362 = vmatpush1.bf16.msk.msra.mxu1 %vm2612_vm2, %v1361_v30  ;;  %vm2614_vm4 = vnez %v2549_v39 }
 0x23c   :  { %v1364_v49 = vpack.c.bf16 %v642_v44, %v2154_v1  ;;  %v1338_v53 = vpack.c.bf16 %v640_v48, %v2144_v58  ;;  %v1367_v56 = vpack.c.bf16 %v639_v47, %v2152_v0  ;;  %v1581_v59 = vpop.permute.xlu1 %1580  ;;  %vm2615_vm15 = vcmp.lt.s32.totalorder %v1886_v13, 111 }
 0x23d   :  { %v1583_v3 = vunpack.i.h.bf16 %v1581_v59  ;;  %v1582_v5 = vunpack.i.l.bf16 %v1581_v59  ;;  %v689_v58 = vsel %vm2615_vm15, %v1597_v43, %v1598_v41  ;;  %vm2616_vm5 = vnez %v2553_v45 }
 0x23e   :  { %1339 = vmatprep.subr.msk.bf16.mxu0 %vm2613_vm10, %v1338_v53  ;;  %1365 = vmatprep.subr.msk.bf16.mxu1 %vm2614_vm4, %v1364_v49  ;;  %vm2617_vm2 = vnez %v2561_v54  ;;  %v1577_v0 = vunpack.i.l.bf16 %v2200_v52  ;;  %vm2618_vm10 = vcmp.lt.s32.totalorder %v1886_v13, 112  ;;  %vm2619_vm4 = vcmp.lt.s32.totalorder %v1886_v13, 113  ;;  %v560_v53 = vld [vmem:[%s2487_s7] sm:$0xf] }
 0x23f   :  { %1342 = vmatpush1.bf16.msk.msra.mxu0 %vm2616_vm5, %v1341_v60  ;;  %1368 = vmatpush1.bf16.msk.msra.mxu1 %vm2617_vm2, %v1367_v56  ;;  %v673_v4 = vsel %vm2618_vm10, %v1587_v63, %v1588_v62  ;;  %vm2620_vm15 = vmmov %vm2619_vm4  ;;  %vm2621_vm5 = vcmp.gt.f32.partialorder %v2083_v40, 0.5  ;;  %v887_v56 = vpop.permute.xlu0 %886 }
 0x240   :  { %v1591_v1 = vpop.permute.xlu1 %1590  ;;  %v658_v7 = vsel %vm2619_vm4, %v1583_v3, %v1577_v0  ;;  %v655_v8 = vsel %vm2620_vm15, %v1582_v5, %v1583_v3  ;;  %v763_v10 = vsel %vm2621_vm5, %v689_v58, 0.0  ;;  %vm2622_vm2 = vmmov %vm2619_vm4  ;;  %vm2630_vm5 = vcmp.gt.f32.partialorder %v2027_v55, 0.5 }
 0x241   :  { %v1593_v61 = vunpack.i.h.bf16 %v1591_v1  ;;  %v1592_v2 = vunpack.i.l.bf16 %v1591_v1  ;;  %v656_v12 = vsel %vm2622_vm2, %v1578_v57, %v1582_v5  ;;  %vm2623_vm8 = vmmov %vm2618_vm10  ;;  %v783_v29 = vpack.c.bf16 %v763_v10, %v763_v10 }
 0x242   :  { %vm2624_vm1 = vmmov %vm2623_vm8  ;;  %vm2631_vm15 = vcmp.gt.f32.partialorder %v2009_v46, 0.5 }
 0x243   :  { %v674_v52 = vsel %vm2623_vm8, %v1593_v61, %v1587_v63  ;;  %v671_v14 = vsel %vm2624_vm1, %v1592_v2, %v1593_v61  ;;  %vm2625_vm10 = vmmov %vm2624_vm1  ;;  %vm2627_vm8 = vcmp.lt.s32.totalorder %v1886_v13, 111 }
 0x244   :  { %v672_v16 = vsel %vm2625_vm10, %v1588_v62, %v1592_v2  ;;  %vm2626_vm4 = vmmov %vm2622_vm2  ;;  %v1370_v19 = vpack.c.bf16 %v674_v52, %v658_v7  ;;  %v1373_v21 = vpack.c.bf16 %v671_v14, %v655_v8  ;;  %v1601_v22 = vpop.permute.xlu1 %1600  ;;  %vm2632_vm10 = vcmp.gt.f32.partialorder %v2037_v9, 0.5 }
 0x245   :  { %v657_v17 = vsel %vm2626_vm4, %v1577_v0, %v1578_v57  ;;  %v1344_v18 = vpack.c.bf16 %v672_v16, %v656_v12  ;;  %v1603_v26 = vunpack.i.h.bf16 %v1601_v22  ;;  %v1602_v27 = vunpack.i.l.bf16 %v1601_v22  ;;  %vm2628_vm1 = vmmov %vm2627_vm8 }
 0x246   :  { %v1347_v23 = vpack.c.bf16 %v673_v4, %v657_v17  ;;  %1371 = vmatprep.subr.msk.bf16.mxu1 %vm2065_vm14, %v1370_v19  ;;  %vm2629_vm2 = vmmov %vm2628_vm1  ;;  %vm2633_vm4 = vcmask 1043456   ;;  %v908_v19 = vld [vmem:[%s2492_s12] sm:$0xff] }
 0x247   :  { %1345 = vmatprep.subr.msk.bf16.mxu0 %vm2051_vm11, %v1344_v18  ;;  %v690_v30 = vsel %vm2627_vm8, %v1603_v26, %v1597_v43  ;;  %v687_v33 = vsel %vm2628_vm1, %v1602_v27, %v1603_v26  ;;  %v688_v34 = vsel %vm2629_vm2, %v1598_v41, %v1602_v27  ;;  %1374 = vmatpush1.bf16.msk.msra.mxu1 %vm2087_vm13, %v1373_v21  ;;  %vm2634_vm8 = vmmov %vm2633_vm4  ;;  %v907_v21 = vld [vmem:[%s2491_s11] sm:$0xff] }
 0x248   :  { %1348 = vmatpush1.bf16.msk.msra.mxu0 %vm2079_vm9, %v1347_v23  ;;  %v766_v35 = vsel %vm2630_vm5, %v690_v30, 0.0  ;;  %v764_v36 = vsel %vm2631_vm15, %v688_v34, 0.0  ;;  %v765_v43 = vsel %vm2632_vm10, %v687_v33, 0.0  ;;  %vm2635_vm1 = vmmov %vm2633_vm4  ;;  %vm2637_vm5 = vcmask 588800  }
 0x249   :  { %v784_v44 = vpack.c.bf16 %v764_v36, %v764_v36  ;;  %v786_v47 = vpack.c.bf16 %v766_v35, %v766_v35  ;;  %v785_v48 = vpack.c.bf16 %v765_v43, %v765_v43  ;;  %v791_v41 = vsel %vm2635_vm1, %v783_v29, 0  ;;  %vm2636_vm2 = vmmov %vm2635_vm1 }
 0x24a   :  { %vm2638_vm15 = vmmov %vm2637_vm5  ;;  %vm2639_vm10 = vcmp.lt.s32.totalorder %v1886_v13, 17 }
 0x24b   :  { %1349 = vmatprep.subr.msk.bf16.mxu0 %vm2633_vm4, %v784_v44  ;;  %1375 = vmatprep.subr.msk.bf16.mxu1 %vm2634_vm8, %v786_v47  ;;  %v797_v49 = vsel %vm2636_vm2, %v785_v48, 0  ;;  %vm2640_vm4 = vmmov %vm2639_vm10  ;;  %vm2643_vm2 = vcmp.lt.s32.totalorder %v1886_v13, 16 }
 0x24c   :  { %811 = vmatpush1.bf16.msra.mxu0 %v791_v41  ;;  %852 = vmatpush1.bf16.msra.mxu1 %v797_v49  ;;  %vm2641_vm8 = vmmov %vm2640_vm4 }
 0x24d   :  { %vm2642_vm1 = vmmov %vm2640_vm4 }
 0x24f   :  { %1350 = vmatmul.mubr.msk.bf16.vlgmr.msra.gmra.mrb[4].mxu0 %vm2637_vm5, %v560_v53  ;;  %1376 = vmatmul.mubr.msk.bf16.vlgmr.msra.gmra.mrb[4].mxu1 %vm2638_vm15, %v560_v53  ;;  %vm2644_vm5 = vmmov %vm2643_vm2 }
 0x250   :  { %1180 = vmatprep.mubr.bf16.mxu0 %v1750_v6  ;;  %1221 = vmatprep.mubr.bf16.mxu1 %v1750_v6  ;;  %vm2645_vm15 = vmmov %vm2643_vm2 }
 0x255   :  { %v896_v59 = vpop.permute.xlu1 %895 }
 0x322   :  { %v836_v60 = vpop.f32.mrb[4].mxu0  ;;  %v877_v62 = vpop.f32.mrb[4].mxu1 }
 0x323   :  { %v889_v63 = vmul.f32 %v887_v56, %v836_v60  ;;  %v891_v3 = vmul.f32 %v887_v56, %v877_v62  ;;  %v838_v5 = vpop.f32.mrb[5].mxu0  ;;  %v879_v58 = vpop.f32.mrb[5].mxu1 }
 0x324   :  { %v890_v57 = vmul.f32 %v887_v56, %v838_v5  ;;  %v892_v0 = vmul.f32 %v887_v56, %v879_v58  ;;  %v840_v1 = vpop.f32.mrb[6].mxu0  ;;  %v881_v61 = vpop.f32.mrb[6].mxu1 }
 0x325   :  { %v2305_v2 = vadd.f32 %v896_v59, %v889_v63  ;;  %v2307_v4 = vadd.f32 %v896_v59, %v891_v3  ;;  %v841_v7 = vpop.f32.mrb[7].mxu0  ;;  %v882_v8 = vpop.f32.mrb[7].mxu1 }
 0x326   :  { %v2309_v10 = vadd.f32 %v896_v59, %v890_v57  ;;  %v2311_v6 = vadd.f32 %v896_v59, %v892_v0 }
 0x327   :  { %v902_v12 = vmax.f32 %v2305_v2, 0.0  ;;  %v904_v52 = vmax.f32 %v2307_v4, 0.0 }
 0x328   :  { %v903_v14 = vmax.f32 %v2309_v10, 0.0  ;;  %v905_v16 = vmax.f32 %v2311_v6, 0.0 }
 0x32a   :  { %v1609_v17 = vpack.i.bf16 %v905_v16, %v904_v52  ;;  %v1604_v18 = vpack.i.bf16 %v903_v14, %v902_v12 }
 0x32c   :  { %1610 = vrot.lane.b32.xlu1 %v1609_v17, %s1744_s30  ;;  %1605 = vrot.lane.b32.xlu0 %v1604_v18, %s1744_s30 }
 0x330   :  { %1620 = vrot.lane.b32.xlu1 %v1609_v17, %s1743_s29  ;;  %1615 = vrot.lane.b32.xlu0 %v1604_v18, %s1743_s29 }
 0x334   :  { %1630 = vrot.lane.b32.xlu1 %v1609_v17, %s1745_s14  ;;  %1625 = vrot.lane.b32.xlu0 %v1604_v18, %s1745_s14 }
 0x338   :  { %1640 = vrot.lane.b32.xlu1 %v1609_v17, %s1746_s0  ;;  %1635 = vrot.lane.b32.xlu0 %v1604_v18, %s1746_s0 }
 0x33c   :  { %1650 = vrot.lane.b32.xlu1 %v1609_v17, %s1747_s15  ;;  %1645 = vrot.lane.b32.xlu0 %v1604_v18, %s1747_s15 }
 0x340   :  { %1660 = vrot.lane.b32.xlu1 %v1609_v17, %s1748_s16  ;;  %1655 = vrot.lane.b32.xlu0 %v1604_v18, %s1748_s16 }
 0x344   :  { %1670 = vrot.lane.b32.xlu1 %v1609_v17, %s1749_s17  ;;  %1665 = vrot.lane.b32.xlu0 %v1604_v18, %s1749_s17 }
 0x348   :  { %1680 = vrot.lane.b32.xlu1 %v1609_v17, %s1751_s18  ;;  %1675 = vrot.lane.b32.xlu0 %v1604_v18, %s1751_s18 }
 0x34c   :  { %1241 = vperm.xlu1 %1522, %v908_v19   ;;  %1232 = vperm.xlu0 %1523, %v907_v21  }
 0x39e   :  { %v1611_v22 = vpop.permute.xlu1 %1610  ;;  %v1606_v23 = vpop.permute.xlu0 %1605 }
 0x39f   :  { %v1613_v26 = vunpack.i.h.bf16 %v1611_v22  ;;  %v1612_v27 = vunpack.i.l.bf16 %v1611_v22  ;;  %v1608_v29 = vunpack.i.h.bf16 %v1606_v23  ;;  %v1607_v30 = vunpack.i.l.bf16 %v1606_v23 }
 0x3a1   :  { %v917_v47 = vsel %vm2639_vm10, %v1612_v27, %v1613_v26  ;;  %v918_v48 = vsel %vm2640_vm4, %v1608_v29, %v1612_v27  ;;  %v919_v41 = vsel %vm2641_vm8, %v1607_v30, %v1608_v29  ;;  %v920_v49 = vsel %vm2642_vm1, %v1613_v26, %v1607_v30  ;;  %vm2646_vm10 = vmmov %vm2643_vm2 }
 0x3a2   :  { %v1621_v33 = vpop.permute.xlu1 %1620  ;;  %v1616_v34 = vpop.permute.xlu0 %1615  ;;  %vm2647_vm4 = vcmp.lt.s32.totalorder %v1886_v13, 15 }
 0x3a3   :  { %v1623_v35 = vunpack.i.h.bf16 %v1621_v33  ;;  %v1622_v36 = vunpack.i.l.bf16 %v1621_v33  ;;  %v1618_v43 = vunpack.i.h.bf16 %v1616_v34  ;;  %v1617_v44 = vunpack.i.l.bf16 %v1616_v34 }
 0x3a5   :  { %v933_v53 = vsel %vm2643_vm2, %v1622_v36, %v1623_v35  ;;  %v934_v56 = vsel %vm2644_vm5, %v1618_v43, %v1622_v36  ;;  %v935_v59 = vsel %vm2645_vm15, %v1617_v44, %v1618_v43  ;;  %v936_v60 = vsel %vm2646_vm10, %v1623_v35, %v1617_v44 }
 0x3a6   :  { %v1404_v62 = vpack.c.bf16 %v933_v53, %v917_v47  ;;  %v1378_v63 = vpack.c.bf16 %v935_v59, %v919_v41  ;;  %v1381_v3 = vpack.c.bf16 %v936_v60, %v920_v49  ;;  %v1407_v5 = vpack.c.bf16 %v934_v56, %v918_v48  ;;  %v1631_v58 = vpop.permute.xlu1 %1630  ;;  %v1626_v57 = vpop.permute.xlu0 %1625 }
 0x3a7   :  { %v1633_v0 = vunpack.i.h.bf16 %v1631_v58  ;;  %v1632_v1 = vunpack.i.l.bf16 %v1631_v58  ;;  %v1628_v61 = vunpack.i.h.bf16 %v1626_v57  ;;  %v1627_v7 = vunpack.i.l.bf16 %v1626_v57 }
 0x3a8   :  { %1379 = vmatprep.subr.msk.bf16.mxu0 %vm1892_vm6, %v1378_v63  ;;  %1405 = vmatprep.subr.msk.bf16.mxu1 %vm1912_vm0, %v1404_v62  ;;  %vm2648_vm6 = vmmov %vm2647_vm4  ;;  %vm2655_vm5 = vnez %v2525_v15  ;;  %vm2656_vm15 = vcmp.lt.s32.totalorder %v1886_v13, 127 }
 0x3a9   :  { %1382 = vmatpush1.bf16.msk.msra.mxu0 %vm1905_vm12, %v1381_v3  ;;  %1408 = vmatpush1.bf16.msk.msra.mxu1 %vm2599_vm7, %v1407_v5  ;;  %v949_v23 = vsel %vm2647_vm4, %v1632_v1, %v1633_v0  ;;  %v950_v28 = vsel %vm2648_vm6, %v1628_v61, %v1632_v1  ;;  %vm2649_vm0 = vmmov %vm2647_vm4  ;;  %vm2651_vm7 = vcmp.lt.s32.totalorder %v1886_v13, 1 }
 0x3aa   :  { %v1641_v8 = vpop.permute.xlu1 %1640  ;;  %v1636_v17 = vpop.permute.xlu0 %1635  ;;  %v951_v42 = vsel %vm2649_vm0, %v1627_v7, %v1628_v61  ;;  %vm2650_vm12 = vmmov %vm2649_vm0  ;;  %vm2660_vm0 = vnez %v2529_v20 }
 0x3ab   :  { %v1643_v18 = vunpack.i.h.bf16 %v1641_v8  ;;  %v1642_v19 = vunpack.i.l.bf16 %v1641_v8  ;;  %v1638_v21 = vunpack.i.h.bf16 %v1636_v17  ;;  %v1637_v22 = vunpack.i.l.bf16 %v1636_v17  ;;  %vm2652_vm8 = vmmov %vm2651_vm7 }
 0x3ac   :  { %v952_v37 = vsel %vm2650_vm12, %v1633_v0, %v1627_v7  ;;  %vm2653_vm1 = vmmov %vm2651_vm7  ;;  %vm2662_vm12 = vnez %v2545_v31 }
 0x3ad   :  { %v965_v50 = vsel %vm2651_vm7, %v1642_v19, %v1643_v18  ;;  %v966_v26 = vsel %vm2652_vm8, %v1638_v21, %v1642_v19  ;;  %v967_v27 = vsel %vm2653_vm1, %v1637_v22, %v1638_v21  ;;  %vm2654_vm2 = vmmov %vm2653_vm1  ;;  %vm2663_vm7 = vnez %v2549_v39 }
 0x3ae   :  { %v968_v29 = vsel %vm2654_vm2, %v1643_v18, %v1637_v22  ;;  %v1410_v30 = vpack.c.bf16 %v965_v50, %v949_v23  ;;  %v1384_v33 = vpack.c.bf16 %v967_v27, %v951_v42  ;;  %v1413_v35 = vpack.c.bf16 %v966_v26, %v950_v28  ;;  %v1651_v36 = vpop.permute.xlu1 %1650  ;;  %v1646_v43 = vpop.permute.xlu0 %1645  ;;  %vm2657_vm10 = vmmov %vm2656_vm15 }
 0x3af   :  { %v1387_v34 = vpack.c.bf16 %v968_v29, %v952_v37  ;;  %v1653_v44 = vunpack.i.h.bf16 %v1651_v36  ;;  %v1652_v47 = vunpack.i.l.bf16 %v1651_v36  ;;  %v1648_v48 = vunpack.i.h.bf16 %v1646_v43  ;;  %vm2658_vm4 = vmmov %vm2657_vm10 }
 0x3b0   :  { %v1647_v41 = vunpack.i.l.bf16 %v1646_v43  ;;  %1385 = vmatprep.subr.msk.bf16.mxu0 %vm1944_vm3, %v1384_v33  ;;  %1411 = vmatprep.subr.msk.bf16.mxu1 %vm2655_vm5, %v1410_v30  ;;  %vm2659_vm6 = vmmov %vm2658_vm4  ;;  %vm2661_vm3 = vnez %v2537_v25  ;;  %vm2664_vm8 = vnez %v2553_v45  ;;  %vm2665_vm1 = vnez %v2561_v54 }
 0x3b1   :  { %v985_v49 = vsel %vm2656_vm15, %v1652_v47, %v1653_v44  ;;  %v986_v53 = vsel %vm2657_vm10, %v1648_v48, %v1652_v47  ;;  %1388 = vmatpush1.bf16.msk.msra.mxu0 %vm2660_vm0, %v1387_v34  ;;  %1414 = vmatpush1.bf16.msk.msra.mxu1 %vm2661_vm3, %v1413_v35  ;;  %vm2666_vm2 = vcmp.lt.s32.totalorder %v1886_v13, 113 }
 0x3b2   :  { %v987_v56 = vsel %vm2658_vm4, %v1647_v41, %v1648_v48  ;;  %v988_v59 = vsel %vm2659_vm6, %v1653_v44, %v1647_v41  ;;  %v1419_v11 = vpack.c.bf16 %v985_v49, %v904_v52  ;;  %v1390_v15 = vpack.c.bf16 %v986_v53, %v903_v14  ;;  %v1661_v63 = vpop.permute.xlu1 %1660  ;;  %v1656_v3 = vpop.permute.xlu0 %1655  ;;  %vm2667_vm5 = vmmov %vm2666_vm2 }
 0x3b3   :  { %v1393_v60 = vpack.c.bf16 %v987_v56, %v902_v12  ;;  %v1416_v62 = vpack.c.bf16 %v988_v59, %v905_v16  ;;  %v1663_v5 = vunpack.i.h.bf16 %v1661_v63  ;;  %v1662_v20 = vunpack.i.l.bf16 %v1661_v63  ;;  %vm2668_vm15 = vmmov %vm2666_vm2 }
 0x3b4   :  { %v1658_v58 = vunpack.i.h.bf16 %v1656_v3  ;;  %v1657_v57 = vunpack.i.l.bf16 %v1656_v3  ;;  %1391 = vmatprep.subr.msk.bf16.mxu0 %vm2662_vm12, %v1390_v15  ;;  %vm2669_vm10 = vmmov %vm2666_vm2  ;;  %vm2670_vm4 = vcmp.lt.s32.totalorder %v1886_v13, 112  ;;  %vm2674_vm12 = vcmp.lt.s32.totalorder %v1886_v13, 111 }
 0x3b5   :  { %1417 = vmatprep.subr.msk.bf16.mxu1 %vm2663_vm7, %v1416_v62  ;;  %1394 = vmatpush1.bf16.msk.msra.mxu0 %vm2664_vm8, %v1393_v60  ;;  %v1001_v52 = vsel %vm2666_vm2, %v1662_v20, %v1663_v5  ;;  %vm2671_vm6 = vmmov %vm2670_vm4  ;;  %vm2680_vm2 = vcmp.gt.f32.partialorder %v2083_v40, 0.5  ;;  %v906_v40 = vld [vmem:[%s2490_s10] sm:$0xf]  ;;  %s1752_s10 = smov [#allocation7]  }
 0x3b6   :  { %1420 = vmatpush1.bf16.msk.msra.mxu1 %vm2665_vm1, %v1419_v11  ;;  %v1671_v25 = vpop.permute.xlu1 %1670  ;;  %v1666_v2 = vpop.permute.xlu0 %1665  ;;  %v1002_v31 = vsel %vm2667_vm5, %v1658_v58, %v1662_v20  ;;  %v1003_v39 = vsel %vm2668_vm15, %v1657_v57, %v1658_v58  ;;  %v1004_v45 = vsel %vm2669_vm10, %v1663_v5, %v1657_v57  ;;  %vm2672_vm0 = vmmov %vm2670_vm4  ;;  %vm2681_vm5 = vcmp.gt.f32.partialorder %v2037_v9, 0.5  ;;  %s1262_s30 = sshll.u32 %s1752_s10, 4  ;;  %s1263_s30 = int_to_ptr.vmem [resolvable:$true] %s1262_s30 }
 0x3b7   :  { %v1673_v4 = vunpack.i.h.bf16 %v1671_v25  ;;  %v1672_v10 = vunpack.i.l.bf16 %v1671_v25  ;;  %v1668_v6 = vunpack.i.h.bf16 %v1666_v2  ;;  %v1667_v12 = vunpack.i.l.bf16 %v1666_v2  ;;  %vm2673_vm3 = vmmov %vm2672_vm0  ;;  %s1714_s14 = scalar_lea.vmem %s1263_s30, 512  ;;  %p1719_p9 = scmp.lt.s32.totalorder %s1263_s30, %s1263_s30 }
 0x3b8   :  { %vm2675_vm7 = vmmov %vm2674_vm12  ;;  %p1715_p8 = scmp.ne.s32.totalorder %s1263_s30, %s1714_s14  ;;  %p1720_p10 = scmp.lt.s32.totalorder %s1714_s14, %s1714_s14 }
 0x3b9   :  { %v1017_v54 = vsel %vm2670_vm4, %v1672_v10, %v1673_v4  ;;  %v1018_v14 = vsel %vm2671_vm6, %v1668_v6, %v1672_v10  ;;  %v1019_v16 = vsel %vm2672_vm0, %v1667_v12, %v1668_v6  ;;  %v1020_v0 = vsel %vm2673_vm3, %v1673_v4, %v1667_v12  ;;  %vm2676_vm8 = vmmov %vm2675_vm7 }
 0x3ba   :  { %v1425_v1 = vpack.c.bf16 %v1017_v54, %v1001_v52  ;;  %v1396_v61 = vpack.c.bf16 %v1018_v14, %v1002_v31  ;;  %v1399_v7 = vpack.c.bf16 %v1019_v16, %v1003_v39  ;;  %v1422_v8 = vpack.c.bf16 %v1020_v0, %v1004_v45  ;;  %v1681_v17 = vpop.permute.xlu1 %1680  ;;  %v1676_v18 = vpop.permute.xlu0 %1675  ;;  %vm2677_vm1 = vmmov %vm2675_vm7  ;;  %p1721_p11 = por %p1720_p10, %p1719_p9 }
 0x3bb   :  { %v1683_v19 = vunpack.i.h.bf16 %v1681_v17  ;;  %v1682_v21 = vunpack.i.l.bf16 %v1681_v17  ;;  %v1678_v22 = vunpack.i.h.bf16 %v1676_v18  ;;  %v1677_v23 = vunpack.i.l.bf16 %v1676_v18 }
 0x3bc   :  { %1397 = vmatprep.subr.msk.bf16.mxu0 %vm2051_vm11, %v1396_v61  ;;  %1423 = vmatprep.subr.msk.bf16.mxu1 %vm2065_vm14, %v1422_v8  ;;  %vm2678_vm11 = vcmp.gt.f32.partialorder %v2009_v46, 0.5  ;;  %vm2679_vm14 = vcmp.gt.f32.partialorder %v2027_v55, 0.5  ;;  %p1722_p12 = pnand %p1721_p11, %p1715_p8 }
 0x3bd   :  { %v1033_v28 = vsel %vm2674_vm12, %v1682_v21, %v1683_v19  ;;  %v1034_v42 = vsel %vm2675_vm7, %v1678_v22, %v1682_v21  ;;  %v1035_v37 = vsel %vm2676_vm8, %v1677_v23, %v1678_v22  ;;  %v1036_v50 = vsel %vm2677_vm1, %v1683_v19, %v1677_v23  ;;  %1400 = vmatpush1.bf16.msk.msra.mxu0 %vm2079_vm9, %v1399_v7 }
 0x3be   :  { %v1110_v24 = vsel %vm2678_vm11, %v1034_v42, 0.0  ;;  %v1112_v32 = vsel %vm2679_vm14, %v1036_v50, 0.0  ;;  %1426 = vmatpush1.bf16.msk.msra.mxu1 %vm2087_vm13, %v1425_v1  ;;  %v1109_v26 = vsel %vm2680_vm2, %v1035_v37, 0.0  ;;  %v1111_v27 = vsel %vm2681_vm5, %v1033_v28, 0.0 }
 0x3bf   :  { %v1130_v13 = vpack.c.bf16 %v1110_v24, %v1110_v24  ;;  %v1132_v29 = vpack.c.bf16 %v1112_v32, %v1112_v32  ;;  %v1129_v30 = vpack.c.bf16 %v1109_v26, %v1109_v26  ;;  %v1131_v38 = vpack.c.bf16 %v1111_v27, %v1111_v27 }
 0x3c0   :  { %vm2682_vm9 = vcmask 1043456   ;;  %vm2686_vm13 = vcmask 588800  }
 0x3c1   :  { %1401 = vmatprep.subr.msk.bf16.mxu0 %vm2682_vm9, %v1130_v13  ;;  %vm2683_vm15 = vmmov %vm2682_vm9 }
 0x3c2   :  { %1427 = vmatprep.subr.msk.bf16.mxu1 %vm2683_vm15, %v1132_v29  ;;  %vm2684_vm10 = vmmov %vm2682_vm9 }
 0x3c3   :  { %v1137_v46 = vsel %vm2684_vm10, %v1129_v30, 0  ;;  %vm2685_vm4 = vmmov %vm2682_vm9 }
 0x3c4   :  { %v1143_v55 = vsel %vm2685_vm4, %v1131_v38, 0  ;;  %1157 = vmatpush1.bf16.msra.mxu0 %v1137_v46  ;;  %vm2687_vm6 = vmmov %vm2686_vm13 }
 0x3c5   :  { %1198 = vmatpush1.bf16.msra.mxu1 %v1143_v55 }
 0x3c7   :  { %1402 = vmatmul.mubr.msk.bf16.vlgmr.msra.gmra.mrb[8].mxu0 %vm2686_vm13, %v906_v40 }
 0x3c8   :  { %1428 = vmatmul.mubr.msk.bf16.vlgmr.msra.gmra.mrb[8].mxu1 %vm2687_vm6, %v906_v40 }
 0x3cb   :  { %v1242_v9 = vpop.permute.xlu1 %1241  ;;  %v1233_v51 = vpop.permute.xlu0 %1232 }
 0x49a   :  { %v1182_v33 = vpop.f32.mrb[8].mxu0 }
 0x49b   :  { %v1223_v34 = vpop.f32.mrb[8].mxu1  ;;  %v1235_v35 = vmul.f32 %v1233_v51, %v1182_v33  ;;  %v1184_v43 = vpop.f32.mrb[9].mxu0 }
 0x49c   :  { %v1237_v36 = vmul.f32 %v1233_v51, %v1223_v34  ;;  %v1225_v44 = vpop.f32.mrb[9].mxu1  ;;  %v1236_v47 = vmul.f32 %v1233_v51, %v1184_v43  ;;  %v1186_v41 = vpop.f32.mrb[10].mxu0 }
 0x49d   :  { %v1238_v48 = vmul.f32 %v1233_v51, %v1225_v44  ;;  %v1227_v49 = vpop.f32.mrb[10].mxu1  ;;  %v1244_v53 = vadd.f32 %v1242_v9, %v1235_v35  ;;  %v1187_v59 = vpop.f32.mrb[11].mxu0 }
 0x49e   :  { %v1246_v56 = vadd.f32 %v1242_v9, %v1237_v36  ;;  %v1228_v11 = vpop.f32.mrb[11].mxu1  ;;  %v1245_v15 = vadd.f32 %v1242_v9, %v1236_v47 }
 0x49f   :  { %v1247_v60 = vadd.f32 %v1242_v9, %v1238_v48  ;;  %v1248_v62 = vmax.f32 %v1244_v53, 0.0 }
 0x4a0   :  { %v1250_v63 = vmax.f32 %v1246_v56, 0.0  ;;  %v1249_v3 = vmax.f32 %v1245_v15, 0.0 }
 0x4a1   :  { %v1251_v5 = vmax.f32 %v1247_v60, 0.0  ;;  %1252 = vst [vmem:[#allocation7] sm:$0xff] %v1248_v62 }
 0x4a2   :  { %1254 = vst [vmem:[#allocation7 + $0x10] sm:$0xff] %v1250_v63  ;;  %1253 = vst [vmem:[#allocation7 + $0x8] sm:$0xff] %v1249_v3 }
 0x4a3   :  { %1255 = vst [vmem:[#allocation7 + $0x18] sm:$0xff] %v1251_v5 }
 0x4a4   :  { %1725 = shalt.err (!%p1722_p12)
}
 0x4a5   :  { %s1726_s16 = scalar_lea.hbm %s2493_s13, 512 }
 0x4a6   :  { %p1727_p13 = scmp.ne.s32.totalorder %s2493_s13, %s1726_s16  ;;  %p1730_p0 = scmp.lt.u32.totalorder %s1726_s16, %s2493_s13 }
 0x4a8   :  { %p1732_p1 = pnand %p1730_p0, %p1727_p13 }
 0x4aa   :  { %1735 = shalt.err (!%p1732_p1)
}
 0x4ab   :  { %1265 = dma.vmem_to_hbm [thread:$0]  %s1263_s30, 512, %s2493_s13, [#allocation6]  }
 0x4ac   :  { %1738 = dma.done.wait [#allocation6], 512  }
 0x4ad   :  { %1739 = vsyncadd [#allocation6], 4294966784 }
 0x4ae   :  { %1269 = vsyncpa [#allocation5], 1 }
 0x4af   :  { %1270 = vsyncpa [#allocation6], 1 }

</bundles_post_ra>
